<compile_context>
chip_gen: v5e
topology: v5e:2x2
jax: 0.10.0
libtpu: 0.0.40
codegen_flags: <defaults>
</compile_context>

<pallas_src>
import functools

import jax
import jax.numpy as jnp
from jax.experimental import pallas as pl
from jax.experimental.pallas import tpu as pltpu

EPS = 1e-5


# --------------------------------------------------------------------------- fused kernel
def _bottleneck_kernel(x_ref, w1_ref, b1_ref, w2_ref, b2_ref, w3_ref, b3_ref,
                       *rest, has_proj):
    if has_proj:
        ws_ref, bs_ref, o_ref, pad_ref, acc_ref = rest
    else:
        o_ref, pad_ref, acc_ref = rest

    B, Ho, Wo, Cout = o_ref.shape
    Cin = x_ref.shape[-1]
    Cm = w1_ref.shape[-1]                   # lane-padded mid channels (multiple of 128)
    M = Ho * Wo
    Wp = Wo + 2                             # row stride of the halo-padded layout
    Ls = (Ho + 2) * Wp                      # rows per image in the flat halo buffer
    tail = pad_ref.shape[0] - B * Ls        # extra zero rows read past the last slab

    # ---- stage 1: conv1 (1x1; stride already folded into the input tile) + bn1 + relu
    x2d = x_ref[...].reshape(B * M, Cin)                                       # bf16
    a1 = jnp.dot(x2d, w1_ref[...], preferred_element_type=jnp.float32) + b1_ref[...]
    a1 = jnp.maximum(a1, 0.0).astype(jnp.bfloat16).reshape(B, Ho, Wo, Cm)

    # ---- stage 2: conv2 (3x3, pad=1) + bn2 + relu  --  flat-halo formulation
    # Bake the W halo in registers, then write each buffer row exactly once per step.
    zcol = jnp.zeros((B, Ho, 1, Cm), jnp.bfloat16)
    a1w = jnp.concatenate([zcol, a1, zcol], axis=2)                # (B, Ho, Wp, Cm)
    zrow = jnp.zeros((Wp, Cm), jnp.bfloat16)
    for b in range(B):                                             # static unroll, B small
        base = b * Ls
        pad_ref[pl.ds(base, Wp), :] = zrow                         # top halo row
        pad_ref[pl.ds(base + Wp, Ho * Wp), :] = a1w[b].reshape(Ho * Wp, Cm)
        pad_ref[pl.ds(base + (Ho + 1) * Wp, Wp), :] = zrow         # bottom halo row
    pad_ref[pl.ds(B * Ls, tail), :] = jnp.zeros((tail, Cm), jnp.bfloat16)

    # 9 taps: each is a contiguous row range of the flat buffer -> one MXU dot,
    # accumulated back-to-back into a VMEM f32 scratch (initialized from tap 0).
    for t in range(9):
        dy, dx = t // 3, t % 3
        patch = pad_ref[pl.ds(dy * Wp + dx, B * Ls), :]            # (B*Ls, Cm) bf16
        contrib = jnp.dot(patch, w2_ref[t], preferred_element_type=jnp.float32)
        if t == 0:
            acc_ref[...] = contrib
        else:
            acc_ref[...] += contrib

    # Extract the valid interior once (rows r = b*Ls + y*Wp + x, y<Ho, x<Wo).
    a2 = acc_ref[...].reshape(B, Ho + 2, Wp, Cm)[:, :Ho, :Wo, :].reshape(B * M, Cm)
    a2 = jnp.maximum(a2 + b2_ref[...], 0.0).astype(jnp.bfloat16)

    # ---- stage 3: shortcut (projection 1x1 + bn, or identity)
    if has_proj:
        sc = jnp.dot(x2d, ws_ref[...], preferred_element_type=jnp.float32) + bs_ref[...]
    else:
        sc = x2d.astype(jnp.float32)        # identity: stride == 1 and Cin == Cout

    # ---- stage 4: conv3 (1x1) + bn3 + residual add + relu   (f32 epilogue)
    y = jnp.dot(a2, w3_ref[...], preferred_element_type=jnp.float32) + b3_ref[...] + sc
    o_ref[...] = jnp.maximum(y, 0.0).reshape(B, Ho, Wo, Cout).astype(o_ref.dtype)


# --------------------------------------------------------------------------- sizing helpers
def _vmem_budget_bytes():
    """Per-step VMEM budget derived from the local generation's physical VMEM."""
    try:
        cap = int(pltpu.get_tpu_info().vmem_capacity_bytes)
    except Exception:                        # query unavailable (e.g. interpret mode)
        cap = 64 * 1024 * 1024
    return max(32 * 1024 * 1024, min(int(cap * 0.75), 112 * 1024 * 1024))


def _pick_batch_block(N, Ho, Wo, Cin, Cm, Cout, out_bytes, weight_bytes, budget):
    """Largest batch block dividing N that keeps >=2 grid steps and fits the VMEM budget."""
    Ls = (Ho + 2) * (Wo + 2)

    def est(b):
        x_t = 2 * b * Ho * Wo * Cin * 2                 # double-buffered bf16 input tile
        o_t = 2 * b * Ho * Wo * Cout * out_bytes        # double-buffered output tile
        halo = (b * Ls + 2 * (Wo + 2) + 8) * Cm * 2     # flat halo scratch (bf16)
        acc = b * Ls * Cm * 4                           # conv2 f32 accumulator
        live = 2 * b * Ho * Wo * Cm * 4                 # live f32 temporaries (rough)
        return x_t + o_t + halo + acc + live + 2 * weight_bytes

    best = 1
    for b in range(1, N + 1):
        if N % b:
            continue
        if N > 1 and N // b < 2:            # keep >=2 grid steps (v7x megacore)
            continue
        if est(b) <= 0.8 * budget:
            best = b
    return best


# --------------------------------------------------------------------------- wrapper
def _bottleneck_impl(x, p, stride, out_dtype, batch_block):
    """x: (N, H, W, Cin) bf16 NHWC -> (N, Ho, Wo, Cout) out_dtype NHWC."""
    if stride != 1:
        # The 1x1 stride-s conv / shortcut only reads pixels (i*s, j*s): subsample before
        # the kernel so the DMA never touches the unused 3/4 of the image.
        x = x[:, ::stride, ::stride, :]
    N, Ho, Wo, Cin = x.shape
    Cm = p["w1"].shape[1]
    Cout = p["w3"].shape[1]
    has_proj = p["ws"] is not None

    budget = _vmem_budget_bytes()
    out_bytes = jnp.dtype(out_dtype).itemsize
    weight_bytes = sum(int(v.size) * v.dtype.itemsize for v in p.values() if v is not None)
    B = batch_block if batch_block is not None else _pick_batch_block(
        N, Ho, Wo, Cin, Cm, Cout, out_bytes, weight_bytes, budget)
    assert N % B == 0, (N, B)

    Wp = Wo + 2
    Ls = (Ho + 2) * Wp
    tail = ((2 * Wp + 2 + 7) // 8) * 8       # zero rows read past the last image slab

    def const_spec(shape):
        nd = len(shape)
        return pl.BlockSpec(shape, lambda n, _nd=nd: (0,) * _nd)

    in_specs = [pl.BlockSpec((B, Ho, Wo, Cin), lambda n: (n, 0, 0, 0)),
                const_spec(p["w1"].shape), const_spec(p["b1"].shape),
                const_spec(p["w2"].shape), const_spec(p["b2"].shape),
                const_spec(p["w3"].shape), const_spec(p["b3"].shape)]
    args = [x, p["w1"], p["b1"], p["w2"], p["b2"], p["w3"], p["b3"]]
    if has_proj:
        in_specs += [const_spec(p["ws"].shape), const_spec(p["bs"].shape)]
        args += [p["ws"], p["bs"]]

    flops = 2 * N * Ho * Wo * (Cin * Cm + 9 * Cm * Cm + Cm * Cout
                               + (Cin * Cout if has_proj else 0))
    bytes_accessed = int(x.size) * 2 + N * Ho * Wo * Cout * out_bytes + weight_bytes

    # TODO(synk): at toy channel counts (Cout=32) the output store is lane-masked; real
    # ResNet channel counts (multiples of 128) give unmasked lane-dense stores.
    return pl.pallas_call(
        functools.partial(_bottleneck_kernel, has_proj=has_proj),
        out_shape=jax.ShapeDtypeStruct((N, Ho, Wo, Cout), out_dtype),
        grid=(N // B,),
        in_specs=in_specs,
        out_specs=pl.BlockSpec((B, Ho, Wo, Cout), lambda n: (n, 0, 0, 0)),
        scratch_shapes=[pltpu.VMEM((B * Ls + tail, Cm), jnp.bfloat16),   # flat halo buffer
                        pltpu.VMEM((B * Ls, Cm), jnp.float32)],          # conv2 accumulator
        compiler_params=pltpu.CompilerParams(
            dimension_semantics=("parallel",),
            vmem_limit_bytes=int(budget)),
        cost_estimate=pl.CostEstimate(flops=int(flops), transcendentals=0,
                                      bytes_accessed=int(bytes_accessed)),
    )(*args)


@functools.partial(jax.jit, static_argnames=("stride", "out_dtype", "batch_block"))
def bottleneck_forward_nhwc(x_nhwc, p, *, stride, out_dtype=jnp.bfloat16, batch_block=None):
    """NHWC entry point for chaining blocks without per-call layout transposes."""
    return _bottleneck_impl(x_nhwc.astype(jnp.bfloat16), p, stride, out_dtype, batch_block)


@functools.partial(jax.jit, static_argnames=("stride", "out_dtype", "batch_block"))
def bottleneck_forward(x_nchw, p, *, stride, out_dtype=jnp.float32, batch_block=None):
    """PyTorch-parity wrapper: (N, Cin, H, W) -> (N, 4*mid, H', W')."""
    x = jnp.transpose(x_nchw, (0, 2, 3, 1)).astype(jnp.bfloat16)       # NHWC, bf16 boundary
    y = _bottleneck_impl(x, p, stride, out_dtype, batch_block)
    return jnp.transpose(y, (0, 3, 1, 2))


# --------------------------------------------------------------------------- reference
def ref_bottleneck(x_nchw, p, stride):
    """Pure-JAX reference using the same folded/padded bf16 weights + f32 accumulation."""
    x = jnp.transpose(x_nchw, (0, 2, 3, 1)).astype(jnp.bfloat16)
    Cm = p["w2"].shape[-1]

    def conv(v, w_hwio, s, padding):
        return jax.lax.conv_general_dilated(
            v, w_hwio, (s, s), padding,
            dimension_numbers=("NHWC", "HWIO", "NHWC"),
            preferred_element_type=jnp.float32)

    out = conv(x, p["w1"][None, None], stride, "VALID") + p["b1"]
    out = jnp.maximum(out, 0.0).astype(jnp.bfloat16)
    out = conv(out, p["w2"].reshape(3, 3, Cm, Cm), 1, [(1, 1), (1, 1)]) + p["b2"]
    out = jnp.maximum(out, 0.0).astype(jnp.bfloat16)
    out = conv(out, p["w3"][None, None], 1, "VALID") + p["b3"]
    if p["ws"] is not None:
        sc = conv(x, p["ws"][None, None], stride, "VALID") + p["bs"]
    else:
        sc = x.astype(jnp.float32)
    out = jnp.maximum(out + sc, 0.0)
    return jnp.transpose(out, (0, 3, 1, 2))


# --------------------------------------------------------------------------- params
def make_params(key, inplane, mid, stride):
    """Random conv weights + inference-mode BN, folded (w*scale) and lane-padded."""
    exp = 4
    cout = mid * exp
    cmp_ = max(128, ((mid + 127) // 128) * 128)      # lane-padded mid ("bottleneck") width
    pad_c = cmp_ - mid
    keys = iter(jax.random.split(key, 24))

    def bn(C):
        gamma = jax.random.uniform(next(keys), (C,), jnp.float32, 0.5, 1.5)
        beta = jax.random.normal(next(keys), (C,), jnp.float32) * 0.1
        mean = jax.random.normal(next(keys), (C,), jnp.float32) * 0.05
        var = jax.random.uniform(next(keys), (C,), jnp.float32, 0.5, 2.0)
        s = gamma / jnp.sqrt(var + EPS)
        return s, beta - mean * s

    w1 = jax.random.normal(next(keys), (inplane, mid), jnp.float32) * 0.1
    w2 = jax.random.normal(next(keys), (9, mid, mid), jnp.float32) * 0.1
    w3 = jax.random.normal(next(keys), (mid, cout), jnp.float32) * 0.1
    s1, b1 = bn(mid)
    s2, b2 = bn(mid)
    s3, b3 = bn(cout)

    w1f = jnp.pad(w1 * s1, ((0, 0), (0, pad_c))).astype(jnp.bfloat16)
    b1f = jnp.pad(b1, ((0, pad_c),)).reshape(1, cmp_).astype(jnp.float32)
    w2f = jnp.pad(w2 * s2, ((0, 0), (0, pad_c), (0, pad_c))).astype(jnp.bfloat16)
    b2f = jnp.pad(b2, ((0, pad_c),)).reshape(1, cmp_).astype(jnp.float32)
    w3f = jnp.pad(w3 * s3, ((0, pad_c), (0, 0))).astype(jnp.bfloat16)
    b3f = b3.reshape(1, cout).astype(jnp.float32)

    if (stride != 1) or (inplane != cout):           # projection shortcut
        ws = jax.random.normal(next(keys), (inplane, cout), jnp.float32) * 0.1
        ss, bs = bn(cout)
        wsf = (ws * ss).astype(jnp.bfloat16)
        bsf = bs.reshape(1, cout).astype(jnp.float32)
    else:                                            # identity shortcut
        wsf, bsf = None, None

    return dict(w1=w1f, b1=b1f, w2=w2f, b2=b2f, w3=w3f, b3=b3f, ws=wsf, bs=bsf)


# --------------------------------------------------------------------------- main
if __name__ == "__main__":
    key = jax.random.PRNGKey(0)
    configs = [
        # projection shortcut, stride 2, f32 output (tight tolerance)
        dict(N=2, inplane=8,  H=16, W=16, mid=8, stride=2, out_dtype=jnp.float32,  tol=5e-3),
        # identity shortcut, stride 1, bf16 output (tolerance covers bf16 rounding)
        dict(N=2, inplane=32, H=16, W=16, mid=8, stride=1, out_dtype=jnp.bfloat16, tol=6e-2),
    ]
    for cfg in configs:
        key, kx, kp = jax.random.split(key, 3)
        x = jax.random.normal(kx, (cfg["N"], cfg["inplane"], cfg["H"], cfg["W"]), jnp.float32)
        params = make_params(kp, cfg["inplane"], cfg["mid"], cfg["stride"])

        out = jax.block_until_ready(
            bottleneck_forward(x, params, stride=cfg["stride"], out_dtype=cfg["out_dtype"]))
        ref = jax.block_until_ready(ref_bottleneck(x, params, cfg["stride"]))

        Ho = (cfg["H"] - 1) // cfg["stride"] + 1
        Wo = (cfg["W"] - 1) // cfg["stride"] + 1
        assert out.shape == (cfg["N"], 4 * cfg["mid"], Ho, Wo), out.shape
        err = float(jnp.max(jnp.abs(out.astype(jnp.float32) - ref)))
        assert err < cfg["tol"], err

    print("KERNEL_OK")
</pallas_src>

<mosaic_0001>
module attributes {stable_mosaic.version = 11 : i64} {
  func.func @_bottleneck_kernel(%arg0: i32, %arg1: memref<1x8x8x8xbf16, #tpu.memory_space<vmem>>, %arg2: memref<8x128xbf16, #tpu.memory_space<vmem>>, %arg3: memref<1x128xf32, #tpu.memory_space<vmem>>, %arg4: memref<9x128x128xbf16, #tpu.memory_space<vmem>>, %arg5: memref<1x128xf32, #tpu.memory_space<vmem>>, %arg6: memref<128x32xbf16, #tpu.memory_space<vmem>>, %arg7: memref<1x32xf32, #tpu.memory_space<vmem>>, %arg8: memref<8x32xbf16, #tpu.memory_space<vmem>>, %arg9: memref<1x32xf32, #tpu.memory_space<vmem>>, %arg10: memref<1x8x8x32xf32, #tpu.memory_space<vmem>>, %arg11: memref<124x128xbf16, #tpu.memory_space<vmem>>, %arg12: memref<100x128xf32, #tpu.memory_space<vmem>>) attributes {dimension_semantics = [#tpu.dimension_semantics<parallel>], iteration_bounds = array<i64: 2>, scalar_prefetch = 0 : i64, scratch_operands = 2 : i64, tpu.core_type = #tpu.core_type<tc>, window_params = [{transform_indices = @transform_0, window_bounds = array<i64: 1, 8, 8, 8>}, {pipeline_mode = #tpu.pipeline_mode<synchronous>, transform_indices = @transform_1, window_bounds = array<i64: 8, 128>}, {pipeline_mode = #tpu.pipeline_mode<synchronous>, transform_indices = @transform_2, window_bounds = array<i64: 1, 128>}, {pipeline_mode = #tpu.pipeline_mode<synchronous>, transform_indices = @transform_3, window_bounds = array<i64: 9, 128, 128>}, {pipeline_mode = #tpu.pipeline_mode<synchronous>, transform_indices = @transform_4, window_bounds = array<i64: 1, 128>}, {pipeline_mode = #tpu.pipeline_mode<synchronous>, transform_indices = @transform_5, window_bounds = array<i64: 128, 32>}, {pipeline_mode = #tpu.pipeline_mode<synchronous>, transform_indices = @transform_6, window_bounds = array<i64: 1, 32>}, {pipeline_mode = #tpu.pipeline_mode<synchronous>, transform_indices = @transform_7, window_bounds = array<i64: 8, 32>}, {pipeline_mode = #tpu.pipeline_mode<synchronous>, transform_indices = @transform_8, window_bounds = array<i64: 1, 32>}, {transform_indices = @transform_9, window_bounds = array<i64: 1, 8, 8, 32>}]} {
    %c0 = arith.constant 0 : index
    %c0_0 = arith.constant 0 : index
    %c0_1 = arith.constant 0 : index
    %c0_2 = arith.constant 0 : index
    %0 = vector.load %arg1[%c0, %c0_0, %c0_1, %c0_2] : memref<1x8x8x8xbf16, #tpu.memory_space<vmem>>, vector<1x8x8x8xbf16>
    %1 = vector.shape_cast %0 : vector<1x8x8x8xbf16> to vector<64x8xbf16>
    %c0_3 = arith.constant 0 : index
    %c0_4 = arith.constant 0 : index
    %2 = vector.load %arg2[%c0_3, %c0_4] : memref<8x128xbf16, #tpu.memory_space<vmem>>, vector<8x128xbf16>
    %cst = arith.constant dense<0.000000e+00> : vector<64x128xf32>
    %3 = tpu.matmul %1, %2, %cst {dimension_numbers = #tpu.dot_dimension_numbers<[1], [0], [0], [1], [0, 0, 1, 1], [], []>} : vector<64x8xbf16>, vector<8x128xbf16>, vector<64x128xf32> -> vector<64x128xf32>
    %c0_5 = arith.constant 0 : index
    %c0_6 = arith.constant 0 : index
    %4 = vector.load %arg3[%c0_5, %c0_6] : memref<1x128xf32, #tpu.memory_space<vmem>>, vector<1x128xf32>
    %5 = vector.broadcast %4 : vector<1x128xf32> to vector<64x128xf32>
    %6 = arith.addf %3, %5 : vector<64x128xf32>
    %cst_7 = arith.constant 0.000000e+00 : f32
    %7 = vector.broadcast %cst_7 : f32 to vector<64x128xf32>
    %8 = arith.maximumf %6, %7 : vector<64x128xf32>
    %9 = arith.truncf %8 : vector<64x128xf32> to vector<64x128xbf16>
    %10 = vector.shape_cast %9 : vector<64x128xbf16> to vector<1x8x8x128xbf16>
    %cst_8 = arith.constant 0.000000e+00 : bf16
    %11 = vector.broadcast %cst_8 : bf16 to vector<1x8x1x128xbf16>
    %12 = tpu.concatenate %11, %10, %11 in 2 : vector<1x8x1x128xbf16>, vector<1x8x8x128xbf16>, vector<1x8x1x128xbf16> -> vector<1x8x10x128xbf16>
    %cst_9 = arith.constant 0.000000e+00 : bf16
    %13 = vector.broadcast %cst_9 : bf16 to vector<10x128xbf16>
    %c0_10 = arith.constant 0 : index
    %c0_11 = arith.constant 0 : index
    %14 = vector.load %arg11[%c0_10, %c0_11] : memref<124x128xbf16, #tpu.memory_space<vmem>>, vector<10x128xbf16>
    tpu.vector_store %arg11[%c0_10, %c0_11], %13 {strides = array<i32>} : memref<124x128xbf16, #tpu.memory_space<vmem>>, vector<10x128xbf16>,
    %15 = vector.shape_cast %12 : vector<1x8x10x128xbf16> to vector<8x10x128xbf16>
    %16 = vector.shape_cast %15 : vector<8x10x128xbf16> to vector<80x128xbf16>
    %c10 = arith.constant 10 : index
    %c0_12 = arith.constant 0 : index
    %17 = vector.load %arg11[%c10, %c0_12] : memref<124x128xbf16, #tpu.memory_space<vmem>>, vector<80x128xbf16>
    tpu.vector_store %arg11[%c10, %c0_12], %16 {strides = array<i32>} : memref<124x128xbf16, #tpu.memory_space<vmem>>, vector<80x128xbf16>,
    %c90 = arith.constant 90 : index
    %c0_13 = arith.constant 0 : index
    %18 = vector.load %arg11[%c90, %c0_13] : memref<124x128xbf16, #tpu.memory_space<vmem>>, vector<10x128xbf16>
    tpu.vector_store %arg11[%c90, %c0_13], %13 {strides = array<i32>} : memref<124x128xbf16, #tpu.memory_space<vmem>>, vector<10x128xbf16>,
    %cst_14 = arith.constant 0.000000e+00 : bf16
    %19 = vector.broadcast %cst_14 : bf16 to vector<24x128xbf16>
    %c100 = arith.constant 100 : index
    %c0_15 = arith.constant 0 : index
    %20 = vector.load %arg11[%c100, %c0_15] : memref<124x128xbf16, #tpu.memory_space<vmem>>, vector<24x128xbf16>
    tpu.vector_store %arg11[%c100, %c0_15], %19 {strides = array<i32>} : memref<124x128xbf16, #tpu.memory_space<vmem>>, vector<24x128xbf16>,
    %c0_16 = arith.constant 0 : index
    %c0_17 = arith.constant 0 : index
    %21 = vector.load %arg11[%c0_16, %c0_17] : memref<124x128xbf16, #tpu.memory_space<vmem>>, vector<100x128xbf16>
    %c0_18 = arith.constant 0 : index
    %c0_19 = arith.constant 0 : index
    %c0_20 = arith.constant 0 : index
    %22 = vector.load %arg4[%c0_18, %c0_19, %c0_20] : memref<9x128x128xbf16, #tpu.memory_space<vmem>>, vector<1x128x128xbf16>
    %23 = vector.shape_cast %22 : vector<1x128x128xbf16> to vector<128x128xbf16>
    %cst_21 = arith.constant dense<0.000000e+00> : vector<100x128xf32>
    %24 = tpu.matmul %21, %23, %cst_21 {dimension_numbers = #tpu.dot_dimension_numbers<[1], [0], [0], [1], [0, 0, 1, 1], [], []>} : vector<100x128xbf16>, vector<128x128xbf16>, vector<100x128xf32> -> vector<100x128xf32>
    %c0_22 = arith.constant 0 : index
    %c0_23 = arith.constant 0 : index
    %25 = vector.load %arg12[%c0_22, %c0_23] : memref<100x128xf32, #tpu.memory_space<vmem>>, vector<100x128xf32>
    tpu.vector_store %arg12[%c0_22, %c0_23], %24 {strides = array<i32>} : memref<100x128xf32, #tpu.memory_space<vmem>>, vector<100x128xf32>,
    %c1 = arith.constant 1 : index
    %c0_24 = arith.constant 0 : index
    %26 = vector.load %arg11[%c1, %c0_24] : memref<124x128xbf16, #tpu.memory_space<vmem>>, vector<100x128xbf16>
    %c1_25 = arith.constant 1 : index
    %c0_26 = arith.constant 0 : index
    %c0_27 = arith.constant 0 : index
    %27 = vector.load %arg4[%c1_25, %c0_26, %c0_27] : memref<9x128x128xbf16, #tpu.memory_space<vmem>>, vector<1x128x128xbf16>
    %28 = vector.shape_cast %27 : vector<1x128x128xbf16> to vector<128x128xbf16>
    %cst_28 = arith.constant dense<0.000000e+00> : vector<100x128xf32>
    %29 = tpu.matmul %26, %28, %cst_28 {dimension_numbers = #tpu.dot_dimension_numbers<[1], [0], [0], [1], [0, 0, 1, 1], [], []>} : vector<100x128xbf16>, vector<128x128xbf16>, vector<100x128xf32> -> vector<100x128xf32>
    %c0_29 = arith.constant 0 : index
    %c0_30 = arith.constant 0 : index
    %30 = vector.load %arg12[%c0_29, %c0_30] : memref<100x128xf32, #tpu.memory_space<vmem>>, vector<100x128xf32>
    %31 = arith.addf %30, %29 : vector<100x128xf32>
    %c0_31 = arith.constant 0 : index
    %c0_32 = arith.constant 0 : index
    %32 = vector.load %arg12[%c0_31, %c0_32] : memref<100x128xf32, #tpu.memory_space<vmem>>, vector<100x128xf32>
    tpu.vector_store %arg12[%c0_31, %c0_32], %31 {strides = array<i32>} : memref<100x128xf32, #tpu.memory_space<vmem>>, vector<100x128xf32>,
    %c2 = arith.constant 2 : index
    %c0_33 = arith.constant 0 : index
    %33 = vector.load %arg11[%c2, %c0_33] : memref<124x128xbf16, #tpu.memory_space<vmem>>, vector<100x128xbf16>
    %c2_34 = arith.constant 2 : index
    %c0_35 = arith.constant 0 : index
    %c0_36 = arith.constant 0 : index
    %34 = vector.load %arg4[%c2_34, %c0_35, %c0_36] : memref<9x128x128xbf16, #tpu.memory_space<vmem>>, vector<1x128x128xbf16>
    %35 = vector.shape_cast %34 : vector<1x128x128xbf16> to vector<128x128xbf16>
    %cst_37 = arith.constant dense<0.000000e+00> : vector<100x128xf32>
    %36 = tpu.matmul %33, %35, %cst_37 {dimension_numbers = #tpu.dot_dimension_numbers<[1], [0], [0], [1], [0, 0, 1, 1], [], []>} : vector<100x128xbf16>, vector<128x128xbf16>, vector<100x128xf32> -> vector<100x128xf32>
    %c0_38 = arith.constant 0 : index
    %c0_39 = arith.constant 0 : index
    %37 = vector.load %arg12[%c0_38, %c0_39] : memref<100x128xf32, #tpu.memory_space<vmem>>, vector<100x128xf32>
    %38 = arith.addf %37, %36 : vector<100x128xf32>
    %c0_40 = arith.constant 0 : index
    %c0_41 = arith.constant 0 : index
    %39 = vector.load %arg12[%c0_40, %c0_41] : memref<100x128xf32, #tpu.memory_space<vmem>>, vector<100x128xf32>
    tpu.vector_store %arg12[%c0_40, %c0_41], %38 {strides = array<i32>} : memref<100x128xf32, #tpu.memory_space<vmem>>, vector<100x128xf32>,
    %c10_42 = arith.constant 10 : index
    %c0_43 = arith.constant 0 : index
    %40 = vector.load %arg11[%c10_42, %c0_43] : memref<124x128xbf16, #tpu.memory_space<vmem>>, vector<100x128xbf16>
    %c3 = arith.constant 3 : index
    %c0_44 = arith.constant 0 : index
    %c0_45 = arith.constant 0 : index
    %41 = vector.load %arg4[%c3, %c0_44, %c0_45] : memref<9x128x128xbf16, #tpu.memory_space<vmem>>, vector<1x128x128xbf16>
    %42 = vector.shape_cast %41 : vector<1x128x128xbf16> to vector<128x128xbf16>
    %cst_46 = arith.constant dense<0.000000e+00> : vector<100x128xf32>
    %43 = tpu.matmul %40, %42, %cst_46 {dimension_numbers = #tpu.dot_dimension_numbers<[1], [0], [0], [1], [0, 0, 1, 1], [], []>} : vector<100x128xbf16>, vector<128x128xbf16>, vector<100x128xf32> -> vector<100x128xf32>
    %c0_47 = arith.constant 0 : index
    %c0_48 = arith.constant 0 : index
    %44 = vector.load %arg12[%c0_47, %c0_48] : memref<100x128xf32, #tpu.memory_space<vmem>>, vector<100x128xf32>
    %45 = arith.addf %44, %43 : vector<100x128xf32>
    %c0_49 = arith.constant 0 : index
    %c0_50 = arith.constant 0 : index
    %46 = vector.load %arg12[%c0_49, %c0_50] : memref<100x128xf32, #tpu.memory_space<vmem>>, vector<100x128xf32>
    tpu.vector_store %arg12[%c0_49, %c0_50], %45 {strides = array<i32>} : memref<100x128xf32, #tpu.memory_space<vmem>>, vector<100x128xf32>,
    %c11 = arith.constant 11 : index
    %c0_51 = arith.constant 0 : index
    %47 = vector.load %arg11[%c11, %c0_51] : memref<124x128xbf16, #tpu.memory_space<vmem>>, vector<100x128xbf16>
    %c4 = arith.constant 4 : index
    %c0_52 = arith.constant 0 : index
    %c0_53 = arith.constant 0 : index
    %48 = vector.load %arg4[%c4, %c0_52, %c0_53] : memref<9x128x128xbf16, #tpu.memory_space<vmem>>, vector<1x128x128xbf16>
    %49 = vector.shape_cast %48 : vector<1x128x128xbf16> to vector<128x128xbf16>
    %cst_54 = arith.constant dense<0.000000e+00> : vector<100x128xf32>
    %50 = tpu.matmul %47, %49, %cst_54 {dimension_numbers = #tpu.dot_dimension_numbers<[1], [0], [0], [1], [0, 0, 1, 1], [], []>} : vector<100x128xbf16>, vector<128x128xbf16>, vector<100x128xf32> -> vector<100x128xf32>
    %c0_55 = arith.constant 0 : index
    %c0_56 = arith.constant 0 : index
    %51 = vector.load %arg12[%c0_55, %c0_56] : memref<100x128xf32, #tpu.memory_space<vmem>>, vector<100x128xf32>
    %52 = arith.addf %51, %50 : vector<100x128xf32>
    %c0_57 = arith.constant 0 : index
    %c0_58 = arith.constant 0 : index
    %53 = vector.load %arg12[%c0_57, %c0_58] : memref<100x128xf32, #tpu.memory_space<vmem>>, vector<100x128xf32>
    tpu.vector_store %arg12[%c0_57, %c0_58], %52 {strides = array<i32>} : memref<100x128xf32, #tpu.memory_space<vmem>>, vector<100x128xf32>,
    %c12 = arith.constant 12 : index
    %c0_59 = arith.constant 0 : index
    %54 = vector.load %arg11[%c12, %c0_59] : memref<124x128xbf16, #tpu.memory_space<vmem>>, vector<100x128xbf16>
    %c5 = arith.constant 5 : index
    %c0_60 = arith.constant 0 : index
    %c0_61 = arith.constant 0 : index
    %55 = vector.load %arg4[%c5, %c0_60, %c0_61] : memref<9x128x128xbf16, #tpu.memory_space<vmem>>, vector<1x128x128xbf16>
    %56 = vector.shape_cast %55 : vector<1x128x128xbf16> to vector<128x128xbf16>
    %cst_62 = arith.constant dense<0.000000e+00> : vector<100x128xf32>
    %57 = tpu.matmul %54, %56, %cst_62 {dimension_numbers = #tpu.dot_dimension_numbers<[1], [0], [0], [1], [0, 0, 1, 1], [], []>} : vector<100x128xbf16>, vector<128x128xbf16>, vector<100x128xf32> -> vector<100x128xf32>
    %c0_63 = arith.constant 0 : index
    %c0_64 = arith.constant 0 : index
    %58 = vector.load %arg12[%c0_63, %c0_64] : memref<100x128xf32, #tpu.memory_space<vmem>>, vector<100x128xf32>
    %59 = arith.addf %58, %57 : vector<100x128xf32>
    %c0_65 = arith.constant 0 : index
    %c0_66 = arith.constant 0 : index
    %60 = vector.load %arg12[%c0_65, %c0_66] : memref<100x128xf32, #tpu.memory_space<vmem>>, vector<100x128xf32>
    tpu.vector_store %arg12[%c0_65, %c0_66], %59 {strides = array<i32>} : memref<100x128xf32, #tpu.memory_space<vmem>>, vector<100x128xf32>,
    %c20 = arith.constant 20 : index
    %c0_67 = arith.constant 0 : index
    %61 = vector.load %arg11[%c20, %c0_67] : memref<124x128xbf16, #tpu.memory_space<vmem>>, vector<100x128xbf16>
    %c6 = arith.constant 6 : index
    %c0_68 = arith.constant 0 : index
    %c0_69 = arith.constant 0 : index
    %62 = vector.load %arg4[%c6, %c0_68, %c0_69] : memref<9x128x128xbf16, #tpu.memory_space<vmem>>, vector<1x128x128xbf16>
    %63 = vector.shape_cast %62 : vector<1x128x128xbf16> to vector<128x128xbf16>
    %cst_70 = arith.constant dense<0.000000e+00> : vector<100x128xf32>
    %64 = tpu.matmul %61, %63, %cst_70 {dimension_numbers = #tpu.dot_dimension_numbers<[1], [0], [0], [1], [0, 0, 1, 1], [], []>} : vector<100x128xbf16>, vector<128x128xbf16>, vector<100x128xf32> -> vector<100x128xf32>
    %c0_71 = arith.constant 0 : index
    %c0_72 = arith.constant 0 : index
    %65 = vector.load %arg12[%c0_71, %c0_72] : memref<100x128xf32, #tpu.memory_space<vmem>>, vector<100x128xf32>
    %66 = arith.addf %65, %64 : vector<100x128xf32>
    %c0_73 = arith.constant 0 : index
    %c0_74 = arith.constant 0 : index
    %67 = vector.load %arg12[%c0_73, %c0_74] : memref<100x128xf32, #tpu.memory_space<vmem>>, vector<100x128xf32>
    tpu.vector_store %arg12[%c0_73, %c0_74], %66 {strides = array<i32>} : memref<100x128xf32, #tpu.memory_space<vmem>>, vector<100x128xf32>,
    %c21 = arith.constant 21 : index
    %c0_75 = arith.constant 0 : index
    %68 = vector.load %arg11[%c21, %c0_75] : memref<124x128xbf16, #tpu.memory_space<vmem>>, vector<100x128xbf16>
    %c7 = arith.constant 7 : index
    %c0_76 = arith.constant 0 : index
    %c0_77 = arith.constant 0 : index
    %69 = vector.load %arg4[%c7, %c0_76, %c0_77] : memref<9x128x128xbf16, #tpu.memory_space<vmem>>, vector<1x128x128xbf16>
    %70 = vector.shape_cast %69 : vector<1x128x128xbf16> to vector<128x128xbf16>
    %cst_78 = arith.constant dense<0.000000e+00> : vector<100x128xf32>
    %71 = tpu.matmul %68, %70, %cst_78 {dimension_numbers = #tpu.dot_dimension_numbers<[1], [0], [0], [1], [0, 0, 1, 1], [], []>} : vector<100x128xbf16>, vector<128x128xbf16>, vector<100x128xf32> -> vector<100x128xf32>
    %c0_79 = arith.constant 0 : index
    %c0_80 = arith.constant 0 : index
    %72 = vector.load %arg12[%c0_79, %c0_80] : memref<100x128xf32, #tpu.memory_space<vmem>>, vector<100x128xf32>
    %73 = arith.addf %72, %71 : vector<100x128xf32>
    %c0_81 = arith.constant 0 : index
    %c0_82 = arith.constant 0 : index
    %74 = vector.load %arg12[%c0_81, %c0_82] : memref<100x128xf32, #tpu.memory_space<vmem>>, vector<100x128xf32>
    tpu.vector_store %arg12[%c0_81, %c0_82], %73 {strides = array<i32>} : memref<100x128xf32, #tpu.memory_space<vmem>>, vector<100x128xf32>,
    %c22 = arith.constant 22 : index
    %c0_83 = arith.constant 0 : index
    %75 = vector.load %arg11[%c22, %c0_83] : memref<124x128xbf16, #tpu.memory_space<vmem>>, vector<100x128xbf16>
    %c8 = arith.constant 8 : index
    %c0_84 = arith.constant 0 : index
    %c0_85 = arith.constant 0 : index
    %76 = vector.load %arg4[%c8, %c0_84, %c0_85] : memref<9x128x128xbf16, #tpu.memory_space<vmem>>, vector<1x128x128xbf16>
    %77 = vector.shape_cast %76 : vector<1x128x128xbf16> to vector<128x128xbf16>
    %cst_86 = arith.constant dense<0.000000e+00> : vector<100x128xf32>
    %78 = tpu.matmul %75, %77, %cst_86 {dimension_numbers = #tpu.dot_dimension_numbers<[1], [0], [0], [1], [0, 0, 1, 1], [], []>} : vector<100x128xbf16>, vector<128x128xbf16>, vector<100x128xf32> -> vector<100x128xf32>
    %c0_87 = arith.constant 0 : index
    %c0_88 = arith.constant 0 : index
    %79 = vector.load %arg12[%c0_87, %c0_88] : memref<100x128xf32, #tpu.memory_space<vmem>>, vector<100x128xf32>
    %80 = arith.addf %79, %78 : vector<100x128xf32>
    %c0_89 = arith.constant 0 : index
    %c0_90 = arith.constant 0 : index
    %81 = vector.load %arg12[%c0_89, %c0_90] : memref<100x128xf32, #tpu.memory_space<vmem>>, vector<100x128xf32>
    tpu.vector_store %arg12[%c0_89, %c0_90], %80 {strides = array<i32>} : memref<100x128xf32, #tpu.memory_space<vmem>>, vector<100x128xf32>,
    %c0_91 = arith.constant 0 : index
    %c0_92 = arith.constant 0 : index
    %82 = vector.load %arg12[%c0_91, %c0_92] : memref<100x128xf32, #tpu.memory_space<vmem>>, vector<100x128xf32>
    %83 = vector.shape_cast %82 : vector<100x128xf32> to vector<1x10x10x128xf32>
    %84 = vector.extract_strided_slice %83 {offsets = [0, 0, 0, 0], sizes = [1, 8, 8, 128], strides = [1, 1, 1, 1]} : vector<1x10x10x128xf32> to vector<1x8x8x128xf32>
    %85 = vector.shape_cast %84 : vector<1x8x8x128xf32> to vector<64x128xf32>
    %c0_93 = arith.constant 0 : index
    %c0_94 = arith.constant 0 : index
    %86 = vector.load %arg5[%c0_93, %c0_94] : memref<1x128xf32, #tpu.memory_space<vmem>>, vector<1x128xf32>
    %87 = vector.broadcast %86 : vector<1x128xf32> to vector<64x128xf32>
    %88 = arith.addf %85, %87 : vector<64x128xf32>
    %cst_95 = arith.constant 0.000000e+00 : f32
    %89 = vector.broadcast %cst_95 : f32 to vector<64x128xf32>
    %90 = arith.maximumf %88, %89 : vector<64x128xf32>
    %91 = arith.truncf %90 : vector<64x128xf32> to vector<64x128xbf16>
    %c0_96 = arith.constant 0 : index
    %c0_97 = arith.constant 0 : index
    %92 = vector.load %arg8[%c0_96, %c0_97] : memref<8x32xbf16, #tpu.memory_space<vmem>>, vector<8x32xbf16>
    %cst_98 = arith.constant dense<0.000000e+00> : vector<64x32xf32>
    %93 = tpu.matmul %1, %92, %cst_98 {dimension_numbers = #tpu.dot_dimension_numbers<[1], [0], [0], [1], [0, 0, 1, 1], [], []>} : vector<64x8xbf16>, vector<8x32xbf16>, vector<64x32xf32> -> vector<64x32xf32>
    %c0_99 = arith.constant 0 : index
    %c0_100 = arith.constant 0 : index
    %94 = vector.load %arg9[%c0_99, %c0_100] : memref<1x32xf32, #tpu.memory_space<vmem>>, vector<1x32xf32>
    %95 = vector.broadcast %94 : vector<1x32xf32> to vector<64x32xf32>
    %96 = arith.addf %93, %95 : vector<64x32xf32>
    %c0_101 = arith.constant 0 : index
    %c0_102 = arith.constant 0 : index
    %97 = vector.load %arg6[%c0_101, %c0_102] : memref<128x32xbf16, #tpu.memory_space<vmem>>, vector<128x32xbf16>
    %cst_103 = arith.constant dense<0.000000e+00> : vector<64x32xf32>
    %98 = tpu.matmul %91, %97, %cst_103 {dimension_numbers = #tpu.dot_dimension_numbers<[1], [0], [0], [1], [0, 0, 1, 1], [], []>} : vector<64x128xbf16>, vector<128x32xbf16>, vector<64x32xf32> -> vector<64x32xf32>
    %c0_104 = arith.constant 0 : index
    %c0_105 = arith.constant 0 : index
    %99 = vector.load %arg7[%c0_104, %c0_105] : memref<1x32xf32, #tpu.memory_space<vmem>>, vector<1x32xf32>
    %100 = vector.broadcast %99 : vector<1x32xf32> to vector<64x32xf32>
    %101 = arith.addf %98, %100 : vector<64x32xf32>
    %102 = arith.addf %101, %96 : vector<64x32xf32>
    %cst_106 = arith.constant 0.000000e+00 : f32
    %103 = vector.broadcast %cst_106 : f32 to vector<64x32xf32>
    %104 = arith.maximumf %102, %103 : vector<64x32xf32>
    %105 = vector.shape_cast %104 : vector<64x32xf32> to vector<1x8x8x32xf32>
    %c0_107 = arith.constant 0 : index
    %c0_108 = arith.constant 0 : index
    %c0_109 = arith.constant 0 : index
    %c0_110 = arith.constant 0 : index
    %106 = vector.load %arg10[%c0_107, %c0_108, %c0_109, %c0_110] : memref<1x8x8x32xf32, #tpu.memory_space<vmem>>, vector<1x8x8x32xf32>
    tpu.vector_store %arg10[%c0_107, %c0_108, %c0_109, %c0_110], %105 {strides = array<i32>} : memref<1x8x8x32xf32, #tpu.memory_space<vmem>>, vector<1x8x8x32xf32>,
    return
  }
  func.func @transform_0(%arg0: i32) -> (i32, i32, i32, i32) {
    %c0_i32 = arith.constant 0 : i32
    %c0_i32_0 = arith.constant 0 : i32
    %c0_i32_1 = arith.constant 0 : i32
    %c0_i32_2 = arith.constant 0 : i32
    return %arg0, %c0_i32, %c0_i32_0, %c0_i32_1 : i32, i32, i32, i32
  }
  func.func @transform_1(%arg0: i32) -> (i32, i32) {
    %c0_i32 = arith.constant 0 : i32
    %c0_i32_0 = arith.constant 0 : i32
    %c0_i32_1 = arith.constant 0 : i32
    return %c0_i32, %c0_i32_0 : i32, i32
  }
  func.func @transform_2(%arg0: i32) -> (i32, i32) {
    %c0_i32 = arith.constant 0 : i32
    %c0_i32_0 = arith.constant 0 : i32
    %c0_i32_1 = arith.constant 0 : i32
    return %c0_i32, %c0_i32_0 : i32, i32
  }
  func.func @transform_3(%arg0: i32) -> (i32, i32, i32) {
    %c0_i32 = arith.constant 0 : i32
    %c0_i32_0 = arith.constant 0 : i32
    %c0_i32_1 = arith.constant 0 : i32
    %c0_i32_2 = arith.constant 0 : i32
    return %c0_i32, %c0_i32_0, %c0_i32_1 : i32, i32, i32
  }
  func.func @transform_4(%arg0: i32) -> (i32, i32) {
    %c0_i32 = arith.constant 0 : i32
    %c0_i32_0 = arith.constant 0 : i32
    %c0_i32_1 = arith.constant 0 : i32
    return %c0_i32, %c0_i32_0 : i32, i32
  }
  func.func @transform_5(%arg0: i32) -> (i32, i32) {
    %c0_i32 = arith.constant 0 : i32
    %c0_i32_0 = arith.constant 0 : i32
    %c0_i32_1 = arith.constant 0 : i32
    return %c0_i32, %c0_i32_0 : i32, i32
  }
  func.func @transform_6(%arg0: i32) -> (i32, i32) {
    %c0_i32 = arith.constant 0 : i32
    %c0_i32_0 = arith.constant 0 : i32
    %c0_i32_1 = arith.constant 0 : i32
    return %c0_i32, %c0_i32_0 : i32, i32
  }
  func.func @transform_7(%arg0: i32) -> (i32, i32) {
    %c0_i32 = arith.constant 0 : i32
    %c0_i32_0 = arith.constant 0 : i32
    %c0_i32_1 = arith.constant 0 : i32
    return %c0_i32, %c0_i32_0 : i32, i32
  }
  func.func @transform_8(%arg0: i32) -> (i32, i32) {
    %c0_i32 = arith.constant 0 : i32
    %c0_i32_0 = arith.constant 0 : i32
    %c0_i32_1 = arith.constant 0 : i32
    return %c0_i32, %c0_i32_0 : i32, i32
  }
  func.func @transform_9(%arg0: i32) -> (i32, i32, i32, i32) {
    %c0_i32 = arith.constant 0 : i32
    %c0_i32_0 = arith.constant 0 : i32
    %c0_i32_1 = arith.constant 0 : i32
    %c0_i32_2 = arith.constant 0 : i32
    return %arg0, %c0_i32, %c0_i32_0, %c0_i32_1 : i32, i32, i32, i32
  }
}

</mosaic_0001>

<bundles_post_ra>
// kernel: bottleneck_forward.1
= control target key start
LH: loop header
LB: loop body
LE: loop exit
PB: predicated region body
PF: predicated region fallthrough
CT: control target
= control target key end

     0   :  { %14 = vsyncpa [#allocation5], 0  ;;  %s4904_s0 = inlined_call_operand.vmem [shape: bf16[2,8,8,8], index: 0, kind: input, shape index: {}]   ;;  %s4905_s1 = inlined_call_operand.vmem [shape: bf16[8,128], index: 1, kind: input, shape index: {}]   ;;  %s4906_s2 = inlined_call_operand.vmem [shape: f32[1,128], index: 2, kind: input, shape index: {}]   ;;  %s4907_s3 = inlined_call_operand.vmem [shape: bf16[9,128,128], index: 3, kind: input, shape index: {}]   ;;  %s4908_s4 = inlined_call_operand.vmem [shape: f32[1,128], index: 4, kind: input, shape index: {}]   ;;  %s4909_s5 = inlined_call_operand.vmem [shape: bf16[128,32], index: 5, kind: input, shape index: {}]   ;;  %s4910_s6 = inlined_call_operand.vmem [shape: f32[1,32], index: 6, kind: input, shape index: {}]   ;;  %s4911_s7 = inlined_call_operand.vmem [shape: bf16[8,32], index: 7, kind: input, shape index: {}]   ;;  %s4912_s8 = inlined_call_operand.vmem [shape: f32[1,32], index: 8, kind: input, shape index: {}]   ;;  %s4913_s9 = inlined_call_operand.hbm [shape: f32[2,8,8,32], index: 9, kind: output, shape index: {}]  }
   0x1   :  { %16 = vsyncpa [#allocation5 + $0x1], 0  ;;  %s4228_s30 = smov 0   ;;  %s4230_s10 = smov 0  }
   0x2   :  { %s4232_s11 = smov 0   ;;  %s4234_s12 = smov 0  }
   0x3 LB: > { %s4249_s13 = sadd.s32 4294967295, %s4173_s12   ;;  %s3203_s14 = sadd.s32 4294967294, %s4173_s12   ;;  %s4173_s12 = sphi %s4234_s12, %s4923_s12   ;;  %s4169_s11 = sphi %s4232_s11, %s4922_s11   ;;  %s4165_s10 = sphi %s4230_s10, %s4921_s10   ;;  %s4161_s30 = sphi %s4228_s30, %s4920_s30  }
   0x4   : > { %s4253_s15 = sadd.s32 1, %s4173_s12   ;;  %s223_s16 = sadd.s32 1, %s4169_s11 }
   0x5   : > { %s220_s17 = ssub.s32 %s4173_s12, %s4253_s15  ;;  %p233_p0 = scmp.ne.s32.totalorder %s4169_s11, %s4165_s10 }
   0x6   : > { %p221_p1 = scmp.eq.s32.totalorder %s220_s17, 0  ;;  %p234_p2 = scmp.eq.s32.totalorder %s4249_s13, 1 }
   0x7   : > { %p239_p3 = scmp.ne.s32.totalorder %s4165_s10, %s4161_s30  ;;  %p240_p4 = scmp.eq.s32.totalorder %s3203_s14, 1 }
   0x8   : > { %s4264_s18 = scalar_select %p221_p1, %s4169_s11, %s223_s16  }
   0x9   : > { %p4266_p5 = por %p234_p2, %p233_p0  ;;  %p4270_p6 = por %p240_p4, %p239_p3 }
   0xa   : > { %p3206_p7 = scmp.ge.s32.totalorder %s4173_s12, 1  ;;  %p290_p8 = scmp.lt.s32.totalorder %s4173_s12, 3 }
   0xc   : > { %p291_p9 = pnand %p3206_p7, %p290_p8 }
   0xd   : > { %p326_p10 = scmp.lt.s32.totalorder (!%p291_p9), %s4249_s13, 1  ;;  %s323_s16 = sand.u32 (!%p291_p9), 1, %s4165_s10  }
   0xe   : > { %294 = sbr.rel (%p291_p9) target bundleno = 774 (0x306), region = 56  ;;  %s3207_s17 = sshll.u32 (!%p291_p9), %s323_s16, 6 }
   0xf   : > { %s4852_s21 = scalar_lea.vmem (!%p291_p9), [#allocation4], %s3207_s17  ;;  %s4052_s22 = sshll.u32 (!%p291_p9), %s4249_s13, 6 }
  0x10   : > { %s3137_s25 = scalar_lea.hbm (!%p291_p9), %s4913_s9, %s4052_s22  ;;  %s3138_s26 = sshll.u32 (!%p291_p9), %s4852_s21, 4  ;;  %s3139_s26 = int_to_ptr.vmem [resolvable:$true] %s3138_s26 }
  0x11   : > { %s3140_s28 = sshll.u32 (!%p291_p9), %s3137_s25, 4  ;;  %s4131_s22 = scalar_lea.hbm (!%p291_p9), %s4913_s9, 128  ;;  %s3141_s28 = int_to_ptr.hbm [resolvable:$true] %s3140_s28 }
  0x12   : > { %s4125_s29 = sshra.s32 (!%p291_p9), %s3141_s28, 4  ;;  %s4126_s29 = int_to_ptr.hbm [resolvable:$true] %s4125_s29 }
  0x13   : > { %v340_v0 = vld [vmem:[%s4905_s1] sm:$0xf]  ;;  %vm378_vm0 = vcmask 1043456   ;;  %s327_s23 = scalar_select %p326_p10, %s4249_s13, 1  ;;  %vm365_vm1 = vcmask 64512   ;;  %v3929_v6 = vld [vmem:[%s4907_s3 + $0x38] sm:$0xff] }
  0x14   : > { %v380_v1 = vsel %vm378_vm0, %v340_v0, 0  ;;  %4053 = vmatpush.bf16.msra.mxu1 %v3929_v6  ;;  %v3928_v7 = vld [vmem:[%s4907_s3 + $0x30] sm:$0xff]  ;;  %v3927_v8 = vld [vmem:[%s4907_s3 + $0x28] sm:$0xff]  ;;  %v3926_v9 = vld [vmem:[%s4907_s3 + $0x20] sm:$0xff]  ;;  %v4175_v21 = vmov 0   ;;  %vm515_vm3 = vcmask 1040384   ;;  %p4132_p0 = scmp.lt.s32.totalorder %s4126_s29, %s4913_s9 }
  0x15   : > { %389 = vmatpush.bf16.msra.mxu0 %v380_v1  ;;  %s3911_s24 = sshll.u32 %s327_s23, 5  ;;  %v3925_v10 = vld [vmem:[%s4907_s3 + $0x18] sm:$0xff]  ;;  %v4313_v11 = vld [vmem:[%s4906_s2] ss:$0 sm:$0xff]  ;;  %v3924_v15 = vld [vmem:[%s4907_s3 + $0x10] sm:$0xff]  ;;  %vm526_vm4 = vcmask 1044480  }
  0x16   : > { %s4285_s27 = scalar_lea.vmem %s4904_s0, %s3911_s24  ;;  %v3957_v12 = vld [vmem:[%s4907_s3 + $0xb8] sm:$0xff]  ;;  %v3956_v17 = vld [vmem:[%s4907_s3 + $0xb0] sm:$0xff]  ;;  %v3923_v20 = vld [vmem:[%s4907_s3 + $0x8] sm:$0xff]  ;;  %537 = vst [vmem:[#allocation2] sm:$0xf] %v4175_v21  ;;  %vm1197_vm8 = vcmask 1046528  }
  0x17   : > { %v3912_v2 = vld [vmem:[%s4285_s27] sm:$0xff]  ;;  %v3913_v3 = vld [vmem:[%s4285_s27 + $0x8] sm:$0xff]  ;;  %v3914_v4 = vld [vmem:[%s4285_s27 + $0x10] sm:$0xff]  ;;  %1266 = vmatpush.bf16.msra.mxu3 %v3957_v12  ;;  %538 = vst [vmem:[#allocation2 + $0x4] sm:$0x1] %v4175_v21  ;;  %vm1887_vm11 = vcmask 1045504  }
  0x18   : > { %3226 = vmatmul.msk.bf16.vlgmr.msra.gmra.mxu0 %vm365_vm1, %v3912_v2  ;;  %v3915_v5 = vld [vmem:[%s4285_s27 + $0x18] sm:$0xff]  ;;  %4054 = vmatpush.bf16.msra.mxu1 %v3928_v7  ;;  %v3942_v19 = vld [vmem:[%s4907_s3 + $0x70] sm:$0xff]  ;;  %v3955_v23 = vld [vmem:[%s4907_s3 + $0xa8] sm:$0xff]  ;;  %699 = vst [vmem:[#allocation2 + $0x2c] sm:$0xe] %v4175_v21  ;;  %vm3116_vm13 = vcmask 261120  }
  0x19   : > { %822 = vmatpush.bf16.msrb.mxu0 %v3929_v6  ;;  %v3943_v13 = vld [vmem:[%s4907_s3 + $0x78] sm:$0xff]  ;;  %v3941_v25 = vld [vmem:[%s4907_s3 + $0x68] sm:$0xff]  ;;  %700 = vst [vmem:[#allocation2 + $0x30] sm:$0x3] %v4175_v21  ;;  %v3922_v27 = vld [vmem:[%s4907_s3] sm:$0xff]  ;;  %s3126_s13 = scalar_lea.sflag [#allocation5], %s323_s16 }
  0x1a   : > { %1052 = vmatpush.bf16.msra.mxu2 %v3943_v13  ;;  %701 = vst [vmem:[#allocation2 + $0x30] sm:$0xc] %v4175_v21  ;;  %v3954_v30 = vld [vmem:[%s4907_s3 + $0xa0] sm:$0xff]  ;;  %vm516_vm2 = vsmask.f32 256  ;;  %v3971_v34 = vld [vmem:[%s4907_s3 + $0xf8] sm:$0xff] }
  0x1b   : > { %1267 = vmatpush.bf16.msra.mxu3 %v3956_v17  ;;  %702 = vst [vmem:[#allocation2 + $0x34] sm:$0xf] %v4175_v21  ;;  %v3940_v33 = vld [vmem:[%s4907_s3 + $0x60] sm:$0xff]  ;;  %vm527_vm5 = vsmask.f32 4352  ;;  %v3953_v38 = vld [vmem:[%s4907_s3 + $0x98] sm:$0xff]  ;;  %vm4357_vm6 = vmand %vm515_vm3, %vm516_vm2 }
  0x1c   : > { %4055 = vmatpush.bf16.msra.mxu1 %v3927_v8  ;;  %703 = vst [vmem:[#allocation2 + $0x38] sm:$0xf] %v4175_v21  ;;  %vm4362_vm7 = vmand %vm526_vm4, %vm527_vm5  ;;  %v3939_v43 = vld [vmem:[%s4907_s3 + $0x58] sm:$0xff]  ;;  %v3970_v45 = vld [vmem:[%s4907_s3 + $0xf0] sm:$0xff]  ;;  %vm941_vm9 = vsmask.f32 7424 }
  0x1d   : > { %823 = vmatpush.bf16.msrb.mxu0 %v3928_v7  ;;  %704 = vst [vmem:[#allocation2 + $0x3c] sm:$0x3] %v4175_v21  ;;  %v3952_v49 = vld [vmem:[%s4907_s3 + $0x90] sm:$0xff]  ;;  %v3969_v58 = vld [vmem:[%s4907_s3 + $0xe8] sm:$0xff]  ;;  %vm1624_vm10 = vsmask.f32 6400 }
  0x1e   : > { %1053 = vmatpush.bf16.msra.mxu2 %v3942_v19  ;;  %v3938_v57 = vld [vmem:[%s4907_s3 + $0x50] sm:$0xff]  ;;  %v3951_v59 = vld [vmem:[%s4907_s3 + $0x88] sm:$0xff]  ;;  %vm2317_vm12 = vsmask.f32 5376 }
  0x1f   : > { %1268 = vmatpush.bf16.msra.mxu3 %v3955_v23  ;;  %v3937_v63 = vld [vmem:[%s4907_s3 + $0x48] sm:$0xff] }
  0x20   : > { %4056 = vmatpush.bf16.msra.mxu1 %v3926_v9 }
  0x21   : > { %824 = vmatpush.bf16.msrb.mxu0 %v3927_v8 }
  0x22   : > { %1054 = vmatpush.bf16.msra.mxu2 %v3941_v25 }
  0x23   : > { %1269 = vmatpush.bf16.msra.mxu3 %v3954_v30 }
  0x24   : > { %4057 = vmatpush.bf16.msra.mxu1 %v3925_v10 }
  0x25   : > { %825 = vmatpush.bf16.msrb.mxu0 %v3926_v9 }
  0x26   : > { %1055 = vmatpush.bf16.msra.mxu2 %v3940_v33 }
  0x27   : > { %1270 = vmatpush.bf16.msra.mxu3 %v3953_v38 }
  0x28   : > { %3227 = vmatmul.msk.bf16.gmra.mxu0 %vm365_vm1, %v3913_v3  ;;  %4058 = vmatpush.bf16.msra.mxu1 %v3924_v15  ;;  %v3968_v3 = vld [vmem:[%s4907_s3 + $0xe0] sm:$0xff] }
  0x29   : > { %826 = vmatpush.bf16.msrb.mxu0 %v3925_v10  ;;  %v3936_v10 = vld [vmem:[%s4907_s3 + $0x40] sm:$0xff] }
  0x2a   : > { %1056 = vmatpush.bf16.msra.mxu2 %v3939_v43 }
  0x2b   : > { %1271 = vmatpush.bf16.msra.mxu3 %v3952_v49 }
  0x2c   : > { %4059 = vmatpush.bf16.msra.mxu1 %v3923_v20 }
  0x2d   : > { %827 = vmatpush.bf16.msrb.mxu0 %v3924_v15 }
  0x2e   : > { %1057 = vmatpush.bf16.msra.mxu2 %v3938_v57 }
  0x2f   : > { %1272 = vmatpush.bf16.msra.mxu3 %v3951_v59 }
  0x30   : > { %4060 = vmatpush.bf16.msra.mxu1 %v3922_v27 }
  0x31   : > { %828 = vmatpush.bf16.msrb.mxu0 %v3923_v20 }
  0x32   : > { %1058 = vmatpush.bf16.msra.mxu2 %v3937_v63 }
  0x35   : > { %829 = vmatpush.bf16.msrb.mxu0 %v3922_v27 }
  0x36   : > { %1059 = vmatpush.bf16.msra.mxu2 %v3936_v10 }
  0x38   : > { %3228 = vmatmul.msk.bf16.gmra.mxu0 %vm365_vm1, %v3914_v4 }
  0x39   : > { %1479 = vmatpush.bf16.msra.mxu0 %v3971_v34 }
  0x3d   : > { %1480 = vmatpush.bf16.msra.mxu0 %v3970_v45 }
  0x41   : > { %1481 = vmatpush.bf16.msra.mxu0 %v3969_v58 }
  0x45   : > { %1482 = vmatpush.bf16.msra.mxu0 %v3968_v3 }
  0x48   : > { %3229 = vmatmul.msk.bf16.gmra.mxu0 %vm365_vm1, %v3915_v5  ;;  %v3950_v5 = vld [vmem:[%s4907_s3 + $0x80] sm:$0xff] }
  0x49   : > { %1273 = vmatpush.bf16.msra.mxu3 %v3950_v5 }
  0x95   : > { %v391_v14 = vpop.f32.mrf.mxu0 }
  0x96   : > { %v392_v16 = vadd.f32 %v4313_v11, %v391_v14 }
  0x98   : > { %v411_v18 = vmax.f32 %v392_v16, 0.0 }
  0x9a   : > { %v419_v22 = vpack.c.bf16 %v411_v18, %v411_v18  ;;  %v3967_v18 = vld [vmem:[%s4907_s3 + $0xd8] sm:$0xff] }
  0x9b   : > { %1483 = vmatpush.bf16.msra.mxu0 %v3967_v18 }
  0x9c   : > { %v435_v24 = vunpack.c.l.b16 %v419_v22 }
  0x9d   : > { %v393_v26 = vpop.f32.mrf.mxu0 }
  0x9e   : > { %v443_v28 = vpack.c.b16 %v435_v24, %v435_v24  ;;  %v394_v29 = vadd.f32 %v4313_v11, %v393_v26  ;;  %v3966_v24 = vld [vmem:[%s4907_s3 + $0xd0] sm:$0xff] }
  0x9f   : > { %1484 = vmatpush.bf16.msra.mxu0 %v3966_v24 }
  0xa0   : > { %v452_v31 = vshrl.u32 %v443_v28, 16  ;;  %v412_v32 = vmax.f32 %v394_v29, 0.0  ;;  %v455_v36 = vshll.u32 %v443_v28, 16 }
  0xa2   : > { %v454_v35 = vrot.slane %v452_v31, 7  ;;  %v420_v37 = vpack.c.bf16 %v412_v32, %v412_v32  ;;  %v3965_v32 = vld [vmem:[%s4907_s3 + $0xc8] sm:$0xff] }
  0xa3   : > { %1485 = vmatpush.bf16.msra.mxu0 %v3965_v32 }
  0xa4   : > { %v457_v40 = vor.u32 %v455_v36, %v454_v35  ;;  %v436_v42 = vunpack.c.l.b16 %v420_v37 }
  0xa5   : > { %v396_v44 = vpop.f32.mrf.mxu0 }
  0xa6   : > { %v518_v46 = vsel %vm4357_vm6, 0, %v457_v40  ;;  %v444_v47 = vpack.c.b16 %v436_v42, %v436_v42  ;;  %v397_v48 = vadd.f32 %v4313_v11, %v396_v44 }
  0xa7   : > { %v529_v50 = vsel %vm4362_vm7, %v518_v46, 0 }
  0xa8   : > { %v547_v51 = vrot.slane %v529_v50, 1  ;;  %v548_v52 = vrot.slane %v529_v50, 2  ;;  %v549_v53 = vrot.slane %v529_v50, 3  ;;  %581 = vst [vmem:[#allocation1 + $0x1] ss:$4 sm:$0xff] %v529_v50  ;;  %v550_v54 = vrot.slane %v529_v50, 4 }
  0xa9   : > { %v459_v55 = vshrl.u32 %v444_v47, 16  ;;  %v413_v56 = vmax.f32 %v397_v48, 0.0  ;;  %v462_v61 = vshll.u32 %v444_v47, 16  ;;  %v3964_v47 = vld [vmem:[%s4907_s3 + $0xc0] sm:$0xff] }
  0xaa   : > { %584 = vst [vmem:[#allocation1 + $0x2] ss:$4 sm:$0xff] %v547_v51  ;;  %v3376_v51 = vld [vmem:[#allocation2] sm:$0xe]  ;;  %1486 = vmatpush.bf16.msra.mxu0 %v3964_v47 }
  0xab   : > { %587 = vst [vmem:[#allocation1 + $0x3] ss:$4 sm:$0xff] %v548_v52  ;;  %v461_v60 = vrot.slane %v459_v55, 7  ;;  %v421_v62 = vpack.c.bf16 %v413_v56, %v413_v56 }
  0xac   : > { %590 = vst [vmem:[#allocation1 + $0x20] ss:$4 sm:$0xff] %v549_v53 }
  0xad   : > { %593 = vst [vmem:[#allocation1 + $0x21] ss:$4 sm:$0xff] %v550_v54  ;;  %v464_v0 = vor.u32 %v462_v61, %v461_v60  ;;  %v437_v1 = vunpack.c.l.b16 %v421_v62  ;;  %v398_v2 = vpop.f32.mrf.mxu0 }
  0xae   : > { %v399_v4 = vadd.f32 %v4313_v11, %v398_v2 }
  0xaf   : > { %v519_v6 = vsel %vm4357_vm6, 0, %v464_v0  ;;  %v445_v7 = vpack.c.b16 %v437_v1, %v437_v1 }
  0xb0   : > { %v530_v8 = vsel %vm4362_vm7, %v519_v6, 0  ;;  %v414_v9 = vmax.f32 %v399_v4, 0.0 }
  0xb1   : > { %v551_v12 = vrot.slane %v530_v8, 1  ;;  %v552_v13 = vrot.slane %v530_v8, 2  ;;  %596 = vst [vmem:[#allocation1 + $0x22] ss:$4 sm:$0xff] %v530_v8  ;;  %v553_v15 = vrot.slane %v530_v8, 3  ;;  %v466_v16 = vshrl.u32 %v445_v7, 16 }
  0xb2   : > { %v600_v14 = vld [vmem:[#allocation1] sm:$0xff]  ;;  %v422_v17 = vpack.c.bf16 %v414_v9, %v414_v9  ;;  %v554_v19 = vrot.slane %v530_v8, 4  ;;  %v469_v21 = vshll.u32 %v445_v7, 16 }
  0xb3   : > { %688 = vst [vmem:[#allocation2 + $0x4] sm:$0xe] %v600_v14  ;;  %v468_v20 = vrot.slane %v466_v16, 7 }
  0xb4   : > { %599 = vst [vmem:[#allocation1 + $0x23] ss:$4 sm:$0xff] %v551_v12  ;;  %v438_v22 = vunpack.c.l.b16 %v422_v17 }
  0xb5   : > { %603 = vst [vmem:[#allocation1] ss:$4 sm:$0xff] %v552_v13  ;;  %v401_v23 = vpop.f32.mrf.mxu0  ;;  %v471_v25 = vor.u32 %v469_v21, %v468_v20 }
  0xb6   : > { %605 = vst [vmem:[#allocation1 + $0x1] ss:$4 sm:$0xff] %v553_v15  ;;  %v446_v26 = vpack.c.b16 %v438_v22, %v438_v22  ;;  %v402_v27 = vadd.f32 %v4313_v11, %v401_v23 }
  0xb7   : > { %607 = vst [vmem:[#allocation1 + $0x2] ss:$4 sm:$0xff] %v554_v19  ;;  %v520_v28 = vsel %vm4357_vm6, 0, %v471_v25 }
  0xb8   : > { %v473_v29 = vshrl.u32 %v446_v26, 16  ;;  %v415_v30 = vmax.f32 %v402_v27, 0.0  ;;  %v531_v31 = vsel %vm4362_vm7, %v520_v28, 0  ;;  %v476_v38 = vshll.u32 %v446_v26, 16 }
  0xb9   : > { %v555_v33 = vrot.slane %v531_v31, 1  ;;  %v557_v34 = vrot.slane %v531_v31, 3  ;;  %609 = vst [vmem:[#allocation1 + $0x3] ss:$4 sm:$0xff] %v531_v31  ;;  %v558_v36 = vrot.slane %v531_v31, 4  ;;  %v556_v43 = vrot.slane %v531_v31, 2 }
  0xba   : > { %v475_v37 = vrot.slane %v473_v29, 7  ;;  %v423_v40 = vpack.c.bf16 %v415_v30, %v415_v30  ;;  %v3916_v42 = vld [vmem:[#allocation2] sm:$0xff] }
  0xbb   : > { %v601_v35 = vld [vmem:[#allocation1 + $0x20] sm:$0xff]  ;;  %830 = vmatmul.bf16.vlgmr.msrb.gmra.mxu0 %v3916_v42  ;;  %v3930_v52 = vld [vmem:[#allocation2] sm:$0xff] }
  0xbc   : > { %689 = vst [vmem:[#allocation2 + $0x8] sm:$0xf] %v601_v35  ;;  %v478_v44 = vor.u32 %v476_v38, %v475_v37  ;;  %v439_v45 = vunpack.c.l.b16 %v423_v40  ;;  %v3944_v55 = vld [vmem:[#allocation2] sm:$0xf0]  ;;  %v945_v63 = vshll.u32 %v3930_v52, 16  ;;  %v943_v10 = vshrl.u32 %v3930_v52, 16 }
  0xbd   : > { %611 = vst [vmem:[#allocation1 + $0x20] ss:$4 sm:$0xff] %v555_v33  ;;  %v403_v46 = vpop.f32.mrf.mxu0  ;;  %v3377_v62 = vor.u32 %v3944_v55, %v3376_v51 }
  0xbe   : > { %615 = vst [vmem:[#allocation1 + $0x22] ss:$4 sm:$0xff] %v557_v34  ;;  %v404_v48 = vadd.f32 %v4313_v11, %v403_v46  ;;  %v521_v49 = vsel %vm4357_vm6, 0, %v478_v44  ;;  %v447_v50 = vpack.c.b16 %v439_v45, %v439_v45  ;;  %v947_v15 = vrot.slane %v945_v63, 1 }
  0xbf   : > { %617 = vst [vmem:[#allocation1 + $0x23] ss:$4 sm:$0xff] %v558_v36  ;;  %v532_v53 = vsel %vm4362_vm7, %v521_v49, 0  ;;  %v1198_v9 = vrot.slane %v3377_v62, 1  ;;  %v3985_v36 = vld [vmem:[%s4907_s3 + $0x138] sm:$0xff]  ;;  %v3982_v62 = vld [vmem:[%s4907_s3 + $0x120] sm:$0xff] }
  0xc0   : > { %613 = vst [vmem:[#allocation1 + $0x21] ss:$4 sm:$0xff] %v556_v43  ;;  %v416_v54 = vmax.f32 %v404_v48, 0.0  ;;  %v618_v56 = vld [vmem:[#allocation1] sm:$0xff]  ;;  %v559_v57 = vrot.slane %v532_v53, 1  ;;  %v561_v58 = vrot.slane %v532_v53, 3  ;;  %v948_v29 = vor.u32 %v947_v15, %v943_v10  ;;  %1742 = vmatpush.bf16.msrb.mxu1 %v3985_v36 }
  0xc1   : > { %690 = vst [vmem:[#allocation2 + $0xc] sm:$0xf] %v618_v56  ;;  %v560_v59 = vrot.slane %v532_v53, 2  ;;  %v480_v60 = vshrl.u32 %v447_v50, 16  ;;  %v562_v0 = vrot.slane %v532_v53, 4  ;;  %v483_v2 = vshll.u32 %v447_v50, 16 }
  0xc2   : > { %v424_v61 = vpack.c.bf16 %v416_v54, %v416_v54  ;;  %621 = vst [vmem:[#allocation1] ss:$4 sm:$0xff] %v532_v53  ;;  %v3984_v43 = vld [vmem:[%s4907_s3 + $0x130] sm:$0xff]  ;;  %v3983_v53 = vld [vmem:[%s4907_s3 + $0x128] sm:$0xff] }
  0xc3   : > { %623 = vst [vmem:[#allocation1 + $0x1] ss:$4 sm:$0xff] %v559_v57  ;;  %v482_v1 = vrot.slane %v480_v60, 7  ;;  %v3958_v52 = vld [vmem:[#allocation2 + $0x4] sm:$0xf0] }
  0xc4   : > { %v440_v3 = vunpack.c.l.b16 %v424_v61  ;;  %627 = vst [vmem:[#allocation1 + $0x3] ss:$4 sm:$0xff] %v561_v58  ;;  %1743 = vmatpush.bf16.msrb.mxu1 %v3984_v43  ;;  %v3448_v58 = vld [vmem:[#allocation2 + $0x4] sm:$0xe] }
  0xc5   : > { %v406_v4 = vpop.f32.mrf.mxu0  ;;  %625 = vst [vmem:[#allocation1 + $0x2] ss:$4 sm:$0xff] %v560_v59  ;;  %v485_v5 = vor.u32 %v483_v2, %v482_v1  ;;  %v3449_v61 = vor.u32 %v3958_v52, %v3448_v58 }
  0xc6   : > { %v448_v6 = vpack.c.b16 %v440_v3, %v440_v3  ;;  %v407_v7 = vadd.f32 %v4313_v11, %v406_v4 }
  0xc7   : > { %v619_v8 = vld [vmem:[#allocation1 + $0x20] sm:$0xff]  ;;  %v522_v12 = vsel %vm4357_vm6, 0, %v485_v5  ;;  %v1411_v10 = vrot.slane %v3449_v61, 1  ;;  %v4028_v61 = vld [vmem:[%s4907_s3 + $0x1f8] sm:$0xff] }
  0xc8   : > { %629 = vst [vmem:[#allocation1 + $0x20] ss:$4 sm:$0xff] %v562_v0  ;;  %v487_v13 = vshrl.u32 %v448_v6, 16  ;;  %v417_v14 = vmax.f32 %v407_v7, 0.0  ;;  %v533_v16 = vsel %vm4362_vm7, %v522_v12, 0  ;;  %v490_v17 = vshll.u32 %v448_v6, 16  ;;  %1744 = vmatpush.bf16.msrb.mxu1 %v3983_v53  ;;  %2435 = vmatpush.bf16.msrb.mxu0 %v4028_v61 }
  0xc9   : > { %691 = vst [vmem:[#allocation2 + $0x10] sm:$0xf] %v619_v8  ;;  %v4433_v18 = vld [vmem:[#allocation2 + $0x8] sm:$0xff]  ;;  %v563_v20 = vrot.slane %v533_v16, 1  ;;  %v564_v21 = vrot.slane %v533_v16, 2  ;;  %v565_v22 = vrot.slane %v533_v16, 3 }
  0xca   : > { %v4435_v19 = vld [vmem:[#allocation2 + $0x8] sm:$0xff]  ;;  %v566_v23 = vrot.slane %v533_v16, 4  ;;  %631 = vst [vmem:[#allocation1 + $0x21] ss:$4 sm:$0xff] %v533_v16  ;;  %v489_v24 = vrot.slane %v487_v13, 7  ;;  %v425_v25 = vpack.c.bf16 %v417_v14, %v417_v14  ;;  %v1199_v27 = vrot.slane %v4433_v18, 1 }
  0xcb   : > { %v3917_v26 = vld [vmem:[#allocation2 + $0x8] sm:$0xff]  ;;  %v950_v28 = vshll.u32 %v4435_v19, 16  ;;  %633 = vst [vmem:[#allocation1 + $0x22] ss:$4 sm:$0xff] %v563_v20  ;;  %v954_v12 = vshrl.u32 %v4435_v19, 16 }
  0xcc   : > { %635 = vst [vmem:[#allocation1 + $0x23] ss:$4 sm:$0xff] %v564_v21  ;;  %v492_v30 = vor.u32 %v490_v17, %v489_v24  ;;  %v636_v31 = vld [vmem:[#allocation1] sm:$0xff]  ;;  %v441_v32 = vunpack.c.l.b16 %v425_v25  ;;  %835 = vmatmul.bf16.gmra.mxu0 %v3917_v26  ;;  %v1200_v34 = vsel %vm1197_vm8, %v1198_v9, %v1199_v27  ;;  %1745 = vmatpush.bf16.msrb.mxu1 %v3982_v62  ;;  %v3981_v24 = vld [vmem:[%s4907_s3 + $0x118] sm:$0xff] }
  0xcd   : > { %v408_v33 = vpop.f32.mrf.mxu0  ;;  %v4442_v35 = vrot.slane %v950_v28, 1  ;;  %639 = vst [vmem:[#allocation1] ss:$4 sm:$0xff] %v565_v22  ;;  %1274 = vmatmul.bf16.vlgmr.msra.gmra.mxu3 %v1200_v34 }
  0xce   : > { %v409_v37 = vadd.f32 %v4313_v11, %v408_v33  ;;  %v523_v38 = vsel %vm4357_vm6, 0, %v492_v30  ;;  %641 = vst [vmem:[#allocation1 + $0x1] ss:$4 sm:$0xff] %v566_v23  ;;  %v449_v40 = vpack.c.b16 %v441_v32, %v441_v32 }
  0xcf   : > { %v953_v42 = vsel %vm941_vm9, %v948_v29, %v4442_v35  ;;  %v534_v44 = vsel %vm4362_vm7, %v523_v38, 0  ;;  %692 = vst [vmem:[#allocation2 + $0x14] sm:$0xf] %v636_v31  ;;  %v956_v23 = vor.u32 %v954_v12, %v4442_v35 }
  0xd0   : > { %v418_v45 = vmax.f32 %v409_v37, 0.0  ;;  %1060 = vmatmul.bf16.vlgmr.msra.gmra.mxu2 %v953_v42  ;;  %v567_v11 = vrot.slane %v534_v44, 1  ;;  %v569_v46 = vrot.slane %v534_v44, 3  ;;  %643 = vst [vmem:[#allocation1 + $0x2] ss:$4 sm:$0xff] %v534_v44  ;;  %v570_v47 = vrot.slane %v534_v44, 4  ;;  %1746 = vmatpush.bf16.msrb.mxu1 %v3981_v24 }
  0xd1   : > { %v494_v48 = vshrl.u32 %v449_v40, 16  ;;  %v497_v49 = vshll.u32 %v449_v40, 16  ;;  %v568_v51 = vrot.slane %v534_v44, 2  ;;  %v4460_v57 = vld [vmem:[#allocation2 + $0xc] sm:$0xff] }
  0xd2   : > { %v426_v50 = vpack.c.bf16 %v418_v45, %v418_v45  ;;  %645 = vst [vmem:[#allocation1 + $0x3] ss:$4 sm:$0xff] %v567_v11  ;;  %v1412_v4 = vrot.slane %v4460_v57, 1  ;;  %v3980_v40 = vld [vmem:[%s4907_s3 + $0x110] sm:$0xff]  ;;  %v4013_v42 = vld [vmem:[%s4907_s3 + $0x1b8] sm:$0xff] }
  0xd3   : > { %v637_v54 = vld [vmem:[#allocation1 + $0x20] sm:$0xff]  ;;  %v496_v55 = vrot.slane %v494_v48, 7  ;;  %2169 = vmatpush.bf16.msrb.mxu3 %v4013_v42  ;;  %v3998_v48 = vld [vmem:[%s4907_s3 + $0x170] sm:$0xff] }
  0xd4   : > { %v442_v56 = vunpack.c.l.b16 %v426_v50  ;;  %649 = vst [vmem:[#allocation1 + $0x21] ss:$4 sm:$0xff] %v569_v46  ;;  %v1413_v21 = vsel %vm1197_vm8, %v1411_v10, %v1412_v4  ;;  %1747 = vmatpush.bf16.msrb.mxu1 %v3980_v40  ;;  %v3520_v40 = vld [vmem:[#allocation2 + $0x4] sm:$0xe]  ;;  %v3973_v42 = vld [vmem:[#allocation2 + $0xc] sm:$0xff] }
  0xd5   : > { %651 = vst [vmem:[#allocation1 + $0x22] ss:$4 sm:$0xff] %v570_v47  ;;  %v499_v59 = vor.u32 %v497_v49, %v496_v55 }
  0xd6   : > { %v450_v60 = vpack.c.b16 %v442_v56, %v442_v56  ;;  %647 = vst [vmem:[#allocation1 + $0x20] ss:$4 sm:$0xff] %v568_v51  ;;  %v3918_v63 = vld [vmem:[#allocation2 + $0x10] sm:$0xff]  ;;  %v3979_v51 = vld [vmem:[%s4907_s3 + $0x108] sm:$0xff] }
  0xd7   : > { %v4465_v0 = vld [vmem:[#allocation2 + $0x10] sm:$0xff]  ;;  %693 = vst [vmem:[#allocation2 + $0x18] sm:$0xf] %v637_v54  ;;  %v524_v2 = vsel %vm4357_vm6, 0, %v499_v59  ;;  %840 = vmatmul.bf16.vlgmr.msra.gmra.mxu1 %v3918_v63  ;;  %v4012_v59 = vld [vmem:[%s4907_s3 + $0x1b0] sm:$0xff] }
  0xd8   : > { %v4467_v1 = vld [vmem:[#allocation2 + $0x10] sm:$0xff]  ;;  %v501_v3 = vshrl.u32 %v450_v60, 16  ;;  %v535_v5 = vsel %vm4362_vm7, %v524_v2, 0  ;;  %v1201_v6 = vrot.slane %v4465_v0, 1  ;;  %v504_v15 = vshll.u32 %v450_v60, 16  ;;  %1748 = vmatpush.bf16.msrb.mxu1 %v3979_v51  ;;  %v3978_v60 = vld [vmem:[%s4907_s3 + $0x100] sm:$0xff]  ;;  %2170 = vmatpush.bf16.msrb.mxu3 %v4012_v59 }
  0xd9   : > { %v958_v7 = vshll.u32 %v4467_v1, 16  ;;  %v571_v8 = vrot.slane %v535_v5, 1  ;;  %v572_v9 = vrot.slane %v535_v5, 2  ;;  %653 = vst [vmem:[#allocation1 + $0x23] ss:$4 sm:$0xff] %v535_v5  ;;  %v573_v13 = vrot.slane %v535_v5, 3 }
  0xda   : > { %v503_v14 = vrot.slane %v501_v3, 7  ;;  %v654_v17 = vld [vmem:[#allocation1] sm:$0xff]  ;;  %v574_v20 = vrot.slane %v535_v5, 4  ;;  %v1202_v19 = vsel %vm1197_vm8, %v1199_v27, %v1201_v6  ;;  %v3999_v27 = vld [vmem:[%s4907_s3 + $0x178] sm:$0xff]  ;;  %v962_v43 = vshrl.u32 %v4467_v1, 16  ;;  %v3997_v3 = vld [vmem:[%s4907_s3 + $0x168] sm:$0xff] }
  0xdb   : > { %v960_v16 = vrot.slane %v958_v7, 1  ;;  %694 = vst [vmem:[#allocation2 + $0x1c] sm:$0xf] %v654_v17  ;;  %1956 = vmatpush.bf16.msrb.mxu2 %v3999_v27  ;;  %v4025_v51 = vld [vmem:[%s4907_s3 + $0x1e0] sm:$0xff] }
  0xdc   : > { %v506_v22 = vor.u32 %v504_v15, %v503_v14  ;;  %1487 = vmatmul.bf16.vlgmr.msra.gmra.mxu0 %v1413_v21  ;;  %657 = vst [vmem:[#allocation1] ss:$4 sm:$0xff] %v571_v8  ;;  %1749 = vmatpush.bf16.msrb.mxu1 %v3978_v60  ;;  %v4011_v14 = vld [vmem:[%s4907_s3 + $0x1a8] sm:$0xff]  ;;  %v4027_v15 = vld [vmem:[%s4907_s3 + $0x1f0] sm:$0xff]  ;;  %v4010_v21 = vld [vmem:[%s4907_s3 + $0x1a0] sm:$0xff] }
  0xdd   : > { %1279 = vmatmul.bf16.gmra.mxu3 %v1202_v19  ;;  %659 = vst [vmem:[#allocation1 + $0x1] ss:$4 sm:$0xff] %v572_v9  ;;  %v961_v26 = vsel %vm941_vm9, %v956_v23, %v960_v16  ;;  %v964_v47 = vor.u32 %v962_v43, %v960_v16  ;;  %v3996_v16 = vld [vmem:[%s4907_s3 + $0x160] sm:$0xff]  ;;  %v890_v19 = vld [vmem:[#allocation2 + $0x30] sm:$0x7]  ;;  %2436 = vmatpush.bf16.msrb.mxu0 %v4027_v15 }
  0xde   : > { %v525_v25 = vsel %vm4357_vm6, 0, %v506_v22  ;;  %661 = vst [vmem:[#allocation1 + $0x2] ss:$4 sm:$0xff] %v573_v13  ;;  %v3960_v32 = vld [vmem:[#allocation2 + $0x14] sm:$0xff]  ;;  %2171 = vmatpush.bf16.msrb.mxu3 %v4011_v14  ;;  %v933_v27 = vunpack.c.l.b16 %v890_v19 }
  0xdf   : > { %v536_v18 = vsel %vm4362_vm7, %v525_v25, 0  ;;  %663 = vst [vmem:[#allocation1 + $0x3] ss:$4 sm:$0xff] %v574_v20  ;;  %v1414_v37 = vrot.slane %v3960_v32, 1  ;;  %1957 = vmatpush.bf16.msrb.mxu2 %v3998_v48  ;;  %v4043_v13 = vld [vmem:[%s4907_s3 + $0x238] sm:$0xff] }
  0xe0   : > { %1065 = vmatmul.bf16.gmra.mxu2 %v961_v26  ;;  %v575_v28 = vrot.slane %v536_v18, 1  ;;  %v576_v29 = vrot.slane %v536_v18, 2  ;;  %v577_v30 = vrot.slane %v536_v18, 3  ;;  %v655_v31 = vld [vmem:[#allocation1 + $0x20] sm:$0xff]  ;;  %v578_v33 = vrot.slane %v536_v18, 4  ;;  %2651 = vmatpush.bf16.msra.mxu1 %v4043_v13 }
  0xe1   : > { %665 = vst [vmem:[#allocation1 + $0x20] ss:$4 sm:$0xff] %v536_v18  ;;  %v1415_v11 = vsel %vm1197_vm8, %v1412_v4, %v1414_v37  ;;  %v717_v25 = vld [vmem:[#allocation2 + $0x30] sm:$0x3]  ;;  %v4567_v32 = vpack.c.b16 %v933_v27, %v933_v27  ;;  %v3974_v15 = vld [vmem:[#allocation2 + $0x14] sm:$0xff] }
  0xe2   : > { %667 = vst [vmem:[#allocation1 + $0x21] ss:$4 sm:$0xff] %v575_v28  ;;  %v3933_v39 = vld [vmem:[#allocation2 + $0x18] sm:$0xff]  ;;  %v1146_v26 = vld [vmem:[#allocation2 + $0x30] sm:$0x7]  ;;  %2172 = vmatpush.bf16.msrb.mxu3 %v4010_v21  ;;  %v1646_v19 = vshll.u32 %v3974_v15, 16 }
  0xe3   : > { %669 = vst [vmem:[#allocation1 + $0x22] ss:$4 sm:$0xff] %v576_v29  ;;  %v3919_v41 = vld [vmem:[#allocation2 + $0x18] sm:$0xff]  ;;  %v966_v35 = vshll.u32 %v3933_v39, 16  ;;  %v970_v62 = vshrl.u32 %v3933_v39, 16  ;;  %1958 = vmatpush.bf16.msrb.mxu2 %v3997_v3  ;;  %v4009_v28 = vld [vmem:[%s4907_s3 + $0x198] sm:$0xff]  ;;  %v1189_v39 = vunpack.c.l.b16 %v1146_v26 }
  0xe4   : > { %671 = vst [vmem:[#allocation1 + $0x23] ss:$4 sm:$0xff] %v577_v30  ;;  %v3947_v34 = vld [vmem:[#allocation2 + $0x18] sm:$0xff]  ;;  %v3995_v29 = vld [vmem:[%s4907_s3 + $0x158] sm:$0xff]  ;;  %v4042_v30 = vld [vmem:[%s4907_s3 + $0x230] sm:$0xff]  ;;  %v994_v14 = vshrl.u32 %v4567_v32, 16 }
  0xe5   : > { %695 = vst [vmem:[#allocation2 + $0x20] sm:$0xf] %v655_v31  ;;  %v1203_v38 = vrot.slane %v3947_v34, 1  ;;  %v968_v44 = vrot.slane %v966_v35, 1  ;;  %v759_v31 = vunpack.c.l.b16 %v717_v25  ;;  %2652 = vmatpush.bf16.msra.mxu1 %v4042_v30  ;;  %v4574_v35 = vpack.c.b16 %v1189_v39, %v1189_v39  ;;  %v4041_v3 = vld [vmem:[%s4907_s3 + $0x228] sm:$0xff]  ;;  %v4001_v27 = vld [vmem:[#allocation2 + $0x10] sm:$0xff] }
  0xe6   : > { %v672_v36 = vld [vmem:[#allocation1] sm:$0xff]  ;;  %2173 = vmatpush.bf16.msrb.mxu3 %v4009_v28  ;;  %v1648_v25 = vrot.slane %v1646_v19, 2  ;;  %v3664_v28 = vld [vmem:[#allocation2 + $0x8] sm:$0xc] }
  0xe7   : > { %696 = vst [vmem:[#allocation2 + $0x24] sm:$0xf] %v672_v36  ;;  %845 = vmatmul.bf16.gmra.mxu1 %v3919_v41  ;;  %v1204_v46 = vsel %vm1197_vm8, %v1201_v6, %v1203_v38  ;;  %v969_v49 = vsel %vm941_vm9, %v964_v47, %v968_v44  ;;  %v972_v2 = vor.u32 %v970_v62, %v968_v44  ;;  %v990_v36 = vshll.u32 %v4567_v32, 16  ;;  %v3992_v62 = vld [vmem:[%s4907_s3 + $0x140] sm:$0xff]  ;;  %v3592_v32 = vld [vmem:[#allocation2 + $0x4] sm:$0xc] }
  0xe8   : > { %675 = vst [vmem:[#allocation1] ss:$4 sm:$0xff] %v578_v33  ;;  %1959 = vmatpush.bf16.msrb.mxu2 %v3996_v16  ;;  %v4008_v33 = vld [vmem:[%s4907_s3 + $0x190] sm:$0xff]  ;;  %v766_v34 = vpack.c.b16 %v759_v31, %v759_v31  ;;  %v1209_v43 = vrot.slane %v4574_v35, 1  ;;  %v4022_v16 = vld [vmem:[%s4907_s3 + $0x1c8] sm:$0xff] }
  0xe9   : > { %2653 = vmatpush.bf16.msra.mxu1 %v4041_v3  ;;  %v3987_v31 = vld [vmem:[#allocation2 + $0xc] sm:$0xff] }
  0xea   : > { %2174 = vmatpush.bf16.msrb.mxu3 %v4008_v33 }
  0xeb   : > { %v673_v45 = vld [vmem:[#allocation1 + $0x20] sm:$0xff] }
  0xec   : > { %697 = vst [vmem:[#allocation2 + $0x28] sm:$0xf] %v673_v45  ;;  %1492 = vmatmul.bf16.gmra.mxu0 %v1415_v11  ;;  %v3961_v53 = vld [vmem:[#allocation2 + $0x1c] sm:$0xff]  ;;  %1960 = vmatpush.bf16.msrb.mxu2 %v3995_v29  ;;  %v3994_v45 = vld [vmem:[%s4907_s3 + $0x150] sm:$0xff] }
  0xed   : > { %1284 = vmatmul.bf16.gmra.mxu3 %v1204_v46  ;;  %v1416_v57 = vrot.slane %v3961_v53, 1  ;;  %v4026_v11 = vld [vmem:[%s4907_s3 + $0x1e8] sm:$0xff]  ;;  %v1634_v53 = vshrl.u32 %v3973_v42, 16  ;;  %v3986_v29 = vld [vmem:[#allocation2 + $0x4] sm:$0xf0] }
  0xee   : > { %v3934_v52 = vld [vmem:[#allocation2 + $0x20] sm:$0xff]  ;;  %2437 = vmatpush.bf16.msrb.mxu0 %v4026_v11  ;;  %v3736_v11 = vld [vmem:[#allocation2 + $0x8] sm:$0xc] }
  0xef   : > { %v676_v50 = vld [vmem:[#allocation1] sm:$0xff]  ;;  %v3948_v54 = vld [vmem:[#allocation2 + $0x20] sm:$0xff]  ;;  %v974_v56 = vshll.u32 %v3934_v52, 16  ;;  %v1417_v0 = vsel %vm1197_vm8, %v1414_v37, %v1416_v57  ;;  %v978_v17 = vshrl.u32 %v3934_v52, 16  ;;  %v3972_v37 = vld [vmem:[#allocation2 + $0x4] sm:$0xf0] }
  0xf0   : > { %1070 = vmatmul.bf16.gmra.mxu2 %v969_v49  ;;  %698 = vst [vmem:[#allocation2 + $0x2c] sm:$0x1] %v676_v50  ;;  %v3920_v55 = vld [vmem:[#allocation2 + $0x20] sm:$0xff]  ;;  %v1205_v58 = vrot.slane %v3948_v54, 1  ;;  %v3521_v47 = vor.u32 %v3972_v37, %v3520_v40  ;;  %v992_v49 = vrot.slane %v990_v36, 1  ;;  %v1637_v54 = vshll.u32 %v3973_v42, 16 }
  0xf1   : > { %v976_v63 = vrot.slane %v974_v56, 1  ;;  %v4007_v46 = vld [vmem:[%s4907_s3 + $0x188] sm:$0xff]  ;;  %1961 = vmatpush.bf16.msrb.mxu2 %v3994_v45  ;;  %v1889_v37 = vrot.slane %v3987_v31, 2 }
  0xf2   : > { %v1206_v1 = vsel %vm1197_vm8, %v1203_v38, %v1205_v58  ;;  %v3993_v50 = vld [vmem:[%s4907_s3 + $0x148] sm:$0xff]  ;;  %2175 = vmatpush.bf16.msrb.mxu3 %v4007_v46  ;;  %v1626_v59 = vshrl.u32 %v3521_v47, 16  ;;  %v1629_v60 = vshll.u32 %v3521_v47, 16  ;;  %2438 = vmatpush.bf16.msrb.mxu0 %v4025_v51  ;;  %v996_v21 = vor.u32 %v994_v14, %v992_v49  ;;  %v4039_v47 = vld [vmem:[%s4907_s3 + $0x218] sm:$0xff] }
  0xf3   : > { %v977_v4 = vsel %vm941_vm9, %v972_v2, %v976_v63  ;;  %v4532_v6 = vld [vmem:[#allocation2 + $0x24] sm:$0xff]  ;;  %v980_v24 = vor.u32 %v978_v17, %v976_v63  ;;  %v4024_v63 = vld [vmem:[%s4907_s3 + $0x1d8] sm:$0xff]  ;;  %v4021_v17 = vld [vmem:[%s4907_s3 + $0x1c0] sm:$0xff] }
  0xf4   : > { %v1418_v10 = vrot.slane %v4532_v6, 1  ;;  %v1631_v6 = vrot.slane %v1629_v60, 2  ;;  %v3975_v33 = vld [vmem:[#allocation2 + $0x1c] sm:$0xff] }
  0xf5   : > { %1962 = vmatpush.bf16.msrb.mxu2 %v3993_v50  ;;  %v1652_v40 = vshrl.u32 %v3975_v33, 16  ;;  %v1655_v42 = vshll.u32 %v3975_v33, 16  ;;  %v4037_v33 = vld [vmem:[%s4907_s3 + $0x208] sm:$0xff] }
  0xf6   : > { %v1419_v22 = vsel %vm1197_vm8, %v1416_v57, %v1418_v10  ;;  %v1360_v57 = vld [vmem:[#allocation2 + $0x34] sm:$0x7]  ;;  %2439 = vmatpush.bf16.msrb.mxu0 %v4024_v63 }
  0xf7   : > { %850 = vmatmul.bf16.gmra.mxu1 %v3920_v55  ;;  %v3935_v5 = vld [vmem:[#allocation2 + $0x28] sm:$0xff]  ;;  %v4006_v55 = vld [vmem:[%s4907_s3 + $0x180] sm:$0xff]  ;;  %v1403_v2 = vunpack.c.l.b16 %v1360_v57  ;;  %v1657_v50 = vrot.slane %v1655_v42, 2 }
  0xf8   : > { %v4534_v7 = vld [vmem:[#allocation2 + $0x28] sm:$0xff]  ;;  %v982_v9 = vshll.u32 %v3935_v5, 16  ;;  %v986_v44 = vshrl.u32 %v3935_v5, 16  ;;  %2176 = vmatpush.bf16.msrb.mxu3 %v4006_v55  ;;  %v1628_v5 = vrot.slane %v1626_v59, 1  ;;  %v4002_v59 = vld [vmem:[#allocation2 + $0x18] sm:$0xff] }
  0xf9   : > { %v3921_v8 = vld [vmem:[#allocation2 + $0x28] sm:$0xff]  ;;  %v1207_v12 = vrot.slane %v4534_v7, 1  ;;  %1963 = vmatpush.bf16.msrb.mxu2 %v3992_v62  ;;  %v3988_v62 = vld [vmem:[#allocation2 + $0x14] sm:$0xff] }
  0xfa   : > { %v984_v20 = vrot.slane %v982_v9, 1  ;;  %v4572_v41 = vld [vmem:[#allocation2 + $0x2c] sm:$0xff]  ;;  %v1410_v9 = vpack.c.b16 %v1403_v2, %v1403_v2  ;;  %v2104_v2 = vrot.slane %v4002_v59, 2 }
  0xfb   : > { %v1208_v23 = vsel %vm1197_vm8, %v1205_v58, %v1207_v12  ;;  %v1420_v38 = vrot.slane %v4572_v41, 1  ;;  %v1210_v56 = vsel %vm1197_vm8, %v1207_v12, %v1209_v43  ;;  %v2966_v58 = vld [vmem:[%s4911_s7] sm:$0xf]  ;;  %v4023_v7 = vld [vmem:[%s4907_s3 + $0x1d0] sm:$0xff]  ;;  %v2102_v41 = vrot.slane %v4001_v27, 2 }
  0xfc   : > { %1497 = vmatmul.bf16.gmra.mxu0 %v1417_v0  ;;  %v985_v18 = vsel %vm941_vm9, %v980_v24, %v984_v20  ;;  %v988_v48 = vor.u32 %v986_v44, %v984_v20  ;;  %v1636_v0 = vrot.slane %v1634_v53, 1  ;;  %v1422_v13 = vrot.slane %v1410_v9, 1  ;;  %v4016_v9 = vld [vmem:[#allocation2 + $0x18] sm:$0xff]  ;;  %v3977_v31 = vld [vmem:[#allocation2 + $0x2c] sm:$0xff] }
  0xfd   : > { %1289 = vmatmul.bf16.gmra.mxu3 %v1206_v1  ;;  %v1421_v52 = vsel %vm1197_vm8, %v1418_v10, %v1420_v38  ;;  %v1639_v1 = vrot.slane %v1637_v54, 2  ;;  %v1632_v10 = vor.u32 %v1631_v6, %v1628_v5  ;;  %2440 = vmatpush.bf16.msrb.mxu0 %v4023_v7  ;;  %v1891_v5 = vrot.slane %v3988_v62, 2 }
  0xfe   : > { %v993_v61 = vsel %vm941_vm9, %v988_v48, %v992_v49  ;;  %v1423_v20 = vsel %vm1197_vm8, %v1420_v38, %v1422_v13  ;;  %v4014_v38 = vld [vmem:[#allocation2 + $0x8] sm:$0xf0]  ;;  %v1654_v49 = vrot.slane %v1652_v40, 1  ;;  %v1670_v40 = vshrl.u32 %v3977_v31, 16 }
  0xff   : > { %v3737_v46 = vor.u32 %v4014_v38, %v3736_v11  ;;  %v1673_v42 = vshll.u32 %v3977_v31, 16 }
 0x100   : > { %1075 = vmatmul.bf16.gmra.mxu2 %v977_v4  ;;  %v2972_v4 = vsel %vm378_vm0, %v2966_v58, 0 }
 0x101   : > { %2981 = vmatpush.bf16.msra.mxu2 %v2972_v4  ;;  %2441 = vmatpush.bf16.msrb.mxu0 %v4022_v16  ;;  %v2319_v54 = vshrl.u32 %v3737_v46, 16  ;;  %v2322_v55 = vshll.u32 %v3737_v46, 16  ;;  %v2336_v16 = vshrl.u32 %v4016_v9, 16 }
 0x103   : > { %v2321_v60 = vrot.slane %v2319_v54, 2 }
 0x105   : > { %2442 = vmatpush.bf16.msrb.mxu0 %v4021_v17  ;;  %v2339_v17 = vshll.u32 %v4016_v9, 16 }
 0x107   : > { %855 = vmatmul.bf16.gmra.mxu1 %v3921_v8  ;;  %v1640_v8 = vor.u32 %v1639_v1, %v1636_v0  ;;  %v3976_v1 = vld [vmem:[#allocation2 + $0x24] sm:$0xff] }
 0x108   : > { %v1661_v7 = vshrl.u32 %v3976_v1, 16 }
 0x109   : > { %v1641_v12 = vsel %vm1624_vm10, %v1632_v10, %v1640_v8  ;;  %v2105_v10 = vsel %vm1887_vm11, %v2102_v41, %v2104_v2 }
 0x10a   : > { %v1663_v14 = vrot.slane %v1661_v7, 1  ;;  %v4036_v7 = vld [vmem:[%s4907_s3 + $0x200] sm:$0xff] }
 0x10c   : > { %1502 = vmatmul.bf16.gmra.mxu0 %v1419_v22  ;;  %v1643_v22 = vshrl.u32 %v3974_v15, 16 }
 0x10d   : > { %1294 = vmatmul.bf16.gmra.mxu3 %v1208_v23  ;;  %v4040_v23 = vld [vmem:[%s4907_s3 + $0x220] sm:$0xff] }
 0x10e   : > { %v1645_v24 = vrot.slane %v1643_v22, 1  ;;  %2654 = vmatpush.bf16.msra.mxu1 %v4040_v23 }
 0x110   : > { %1080 = vmatmul.bf16.gmra.mxu2 %v985_v18  ;;  %v1649_v26 = vor.u32 %v1648_v25, %v1645_v24  ;;  %v4000_v18 = vld [vmem:[#allocation2 + $0x8] sm:$0xf0]  ;;  %v2338_v24 = vrot.slane %v2336_v16, 2  ;;  %v2341_v25 = vrot.slane %v2339_v17, 3 }
 0x111   : > { %v3665_v30 = vor.u32 %v4000_v18, %v3664_v28  ;;  %v4651_v28 = vld [vmem:[#allocation2 + $0x1c] sm:$0xff]  ;;  %v4018_v16 = vld [vmem:[#allocation2 + $0x28] sm:$0xff] }
 0x112   : > { %v1650_v39 = vsel %vm1624_vm10, %v1640_v8, %v1649_v26  ;;  %2655 = vmatpush.bf16.msra.mxu1 %v4039_v47  ;;  %v1664_v8 = vshll.u32 %v3976_v1, 16  ;;  %v1672_v47 = vrot.slane %v1670_v40, 1 }
 0x113   : > { %v2101_v36 = vrot.slane %v3665_v30, 2  ;;  %v2342_v30 = vor.u32 %v2341_v25, %v2338_v24  ;;  %v2354_v25 = vshrl.u32 %v4018_v16, 16 }
 0x114   : > { %v1666_v15 = vrot.slane %v1664_v8, 2 }
 0x115   : > { %v2103_v44 = vsel %vm1887_vm11, %v2101_v36, %v2102_v41  ;;  %v1893_v36 = vrot.slane %v4651_v28, 2 }
 0x116   : > { %v1667_v23 = vor.u32 %v1666_v15, %v1663_v14 }
 0x117   : > { %860 = vmatmul.bf16.gmra.mxu1 %v766_v34  ;;  %v3593_v34 = vor.u32 %v3986_v29, %v3592_v32  ;;  %v1894_v46 = vsel %vm1887_vm11, %v1891_v5, %v1893_v36 }
 0x119   : > { %v1888_v45 = vrot.slane %v3593_v34, 2 }
 0x11b   : > { %v1890_v48 = vsel %vm1887_vm11, %v1888_v45, %v1889_v37 }
 0x11c   : > { %1507 = vmatmul.bf16.gmra.mxu0 %v1421_v52 }
 0x11d   : > { %1299 = vmatmul.bf16.gmra.mxu3 %v1210_v56  ;;  %v1658_v56 = vor.u32 %v1657_v50, %v1654_v49 }
 0x11f   : > { %v1659_v63 = vsel %vm1624_vm10, %v1649_v26, %v1658_v56  ;;  %v4647_v26 = vld [vmem:[#allocation2 + $0x20] sm:$0xff]  ;;  %v1668_v29 = vsel %vm1624_vm10, %v1658_v56, %v1667_v23 }
 0x120   : > { %1085 = vmatmul.bf16.gmra.mxu2 %v993_v61  ;;  %v2324_v61 = vrot.slane %v2322_v55, 3  ;;  %v2106_v32 = vrot.slane %v4647_v26, 2  ;;  %v2357_v26 = vshll.u32 %v4018_v16, 16 }
 0x122   : > { %v2325_v4 = vor.u32 %v2324_v61, %v2321_v60  ;;  %v4004_v61 = vld [vmem:[#allocation2 + $0x28] sm:$0xff] }
 0x127   : > { %1750 = vmatmul.bf16.vlgmr.msrb.gmra.mxu1 %v1641_v12  ;;  %v4038_v12 = vld [vmem:[%s4907_s3 + $0x210] sm:$0xff] }
 0x128   : > { %2656 = vmatpush.bf16.msra.mxu1 %v4038_v12 }
 0x12c   : > { %1512 = vmatmul.bf16.gmra.mxu0 %v1423_v20  ;;  %2657 = vmatpush.bf16.msra.mxu1 %v4037_v33  ;;  %v4005_v33 = vld [vmem:[#allocation2 + $0x30] sm:$0xff] }
 0x12d   : > { %1304 = vmatmul.bf16.gmra.mxu3 %v1209_v43  ;;  %v4015_v43 = vld [vmem:[#allocation2 + $0x10] sm:$0xff] }
 0x12e   : > { %v2327_v51 = vshrl.u32 %v4015_v43, 16  ;;  %v2330_v52 = vshll.u32 %v4015_v43, 16  ;;  %v4017_v43 = vld [vmem:[#allocation2 + $0x20] sm:$0xff] }
 0x12f   : > { %v2345_v49 = vshrl.u32 %v4017_v43, 16  ;;  %v2348_v50 = vshll.u32 %v4017_v43, 16 }
 0x130   : > { %1090 = vmatmul.bf16.gmra.mxu2 %v996_v21  ;;  %v2329_v57 = vrot.slane %v2327_v51, 2  ;;  %v2332_v58 = vrot.slane %v2330_v52, 3  ;;  %v4666_v51 = vld [vmem:[#allocation2 + $0x34] sm:$0xff]   ;;  %2658 = vmatpush.bf16.msra.mxu1 %v4036_v7 }
 0x131   : > { %v1616_v56 = vunpack.c.l.b16 %v4666_v51  ;;  %v2347_v59 = vrot.slane %v2345_v49, 2  ;;  %v2350_v60 = vrot.slane %v2348_v50, 3 }
 0x132   : > { %v2333_v0 = vor.u32 %v2332_v58, %v2329_v57 }
 0x134   : > { %v2334_v6 = vsel %vm2317_vm12, %v2325_v4, %v2333_v0  ;;  %v2343_v38 = vsel %vm2317_vm12, %v2333_v0, %v2342_v30  ;;  %v3990_v0 = vld [vmem:[#allocation2 + $0x24] sm:$0xff]  ;;  %v1623_v4 = vpack.c.b16 %v1616_v56, %v1616_v56 }
 0x136   : > { %v1679_v14 = vshrl.u32 %v1623_v4, 16  ;;  %v1682_v15 = vshll.u32 %v1623_v4, 16 }
 0x137   : > { %1755 = vmatmul.bf16.gmra.mxu1 %v1650_v39 }
 0x138   : > { %v831_v35 = vpop.f32.mrf.mxu0  ;;  %v1684_v24 = vrot.slane %v1682_v15, 2 }
 0x13c   : > { %1517 = vmatmul.bf16.gmra.mxu0 %v1422_v13  ;;  %v1892_v13 = vsel %vm1887_vm11, %v1889_v37, %v1891_v5 }
 0x13d   : > { %2177 = vmatmul.bf16.vlgmr.msrb.gmra.mxu3 %v2103_v44  ;;  %v2107_v44 = vsel %vm1887_vm11, %v2104_v2, %v2106_v32  ;;  %v2351_v2 = vor.u32 %v2350_v60, %v2347_v59 }
 0x140   : > { %1964 = vmatmul.bf16.vlgmr.msrb.gmra.mxu2 %v1890_v48  ;;  %v833_v53 = vpop.f32.mrf.mxu0  ;;  %v1675_v48 = vrot.slane %v1673_v42, 2  ;;  %v2110_v42 = vrot.slane %v4005_v33, 2 }
 0x142   : > { %v1676_v58 = vor.u32 %v1675_v48, %v1672_v47  ;;  %v4019_v48 = vld [vmem:[#allocation2 + $0x30] sm:$0xff] }
 0x143   : > { %v2366_v56 = vshll.u32 %v4019_v48, 16 }
 0x144   : > { %v1677_v1 = vsel %vm1624_vm10, %v1667_v23, %v1676_v58  ;;  %v1681_v23 = vrot.slane %v1679_v14, 1 }
 0x145   : > { %v2368_v4 = vrot.slane %v2366_v56, 3 }
 0x146   : > { %v1685_v31 = vor.u32 %v1684_v24, %v1681_v23  ;;  %v3760_v23 = vld [vmem:[#allocation2 + $0x38] sm:$0xf]  ;;  %v4020_v24 = vld [vmem:[#allocation2 + $0x38] sm:$0x10] }
 0x147   : > { %1760 = vmatmul.bf16.gmra.mxu1 %v1659_v63 }
 0x149   : > { %v4637_v3 = vpop.f32.mrf.mxu0 }
 0x14c   : > { %2443 = vmatmul.bf16.vlgmr.msrb.gmra.mxu0 %v2334_v6  ;;  %v2108_v6 = vrot.slane %v4004_v61, 2 }
 0x14d   : > { %2182 = vmatmul.bf16.gmra.mxu3 %v2105_v10  ;;  %v1895_v10 = vrot.slane %v3990_v0, 2 }
 0x14e   : > { %v2109_v17 = vsel %vm1887_vm11, %v2106_v32, %v2108_v6  ;;  %v2359_v32 = vrot.slane %v2357_v26, 3  ;;  %v2111_v49 = vsel %vm1887_vm11, %v2108_v6, %v2110_v42  ;;  %v3761_v26 = vor.u32 %v4020_v24, %v3760_v23 }
 0x150   : > { %1969 = vmatmul.bf16.gmra.mxu2 %v1892_v13  ;;  %v1275_v20 = vpop.f32.mrf.mxu3  ;;  %v2352_v13 = vsel %vm2317_vm12, %v2342_v30, %v2351_v2 }
 0x151   : > { %v4645_v21 = vpop.f32.mrf.mxu0 }
 0x153   : > { %v1061_v22 = vpop.f32.mrf.mxu2 }
 0x154   : > { %v1108_v19 = vadd.f32 %v1061_v22, %v831_v35  ;;  %v4649_v18 = vpop.f32.mrf.mxu1 }
 0x156   : > { %v1322_v27 = vadd.f32 %v1275_v20, %v1108_v19  ;;  %v1896_v19 = vsel %vm1887_vm11, %v1893_v36, %v1895_v10  ;;  %v3991_v36 = vld [vmem:[#allocation2 + $0x2c] sm:$0xff] }
 0x157   : > { %1765 = vmatmul.bf16.gmra.mxu1 %v1668_v29 }
 0x158   : > { %v1277_v39 = vpop.f32.mrf.mxu3 }
 0x159   : > { %v1488_v41 = vpop.f32.mrf.mxu0 }
 0x15a   : > { %v4658_v34 = vadd.f32 %v1488_v41, %v1322_v27 }
 0x15b   : > { %v1063_v35 = vpop.f32.mrf.mxu2 }
 0x15c   : > { %v1109_v37 = vadd.f32 %v1063_v35, %v833_v53  ;;  %2448 = vmatmul.bf16.gmra.mxu0 %v2343_v38  ;;  %v4663_v45 = vpop.f32.mrf.mxu1 }
 0x15d   : > { %2187 = vmatmul.bf16.gmra.mxu3 %v2107_v44 }
 0x15e   : > { %v1323_v11 = vadd.f32 %v1277_v39, %v1109_v37  ;;  %v2356_v39 = vrot.slane %v2354_v25, 2  ;;  %v1686_v37 = vsel %vm1624_vm10, %v1676_v58, %v1685_v31  ;;  %v4030_v25 = vld [vmem:[#allocation2 + $0x10] sm:$0xff] }
 0x160   : > { %1974 = vmatmul.bf16.gmra.mxu2 %v1894_v46  ;;  %v1280_v52 = vpop.f32.mrf.mxu3  ;;  %v2360_v38 = vor.u32 %v2359_v32, %v2356_v39  ;;  %v1897_v46 = vrot.slane %v3991_v36, 2  ;;  %v2372_v39 = vshrl.u32 %v3761_v26, 16  ;;  %v2584_v36 = vrot.slane %v4030_v25, 3 }
 0x161   : > { %v1490_v53 = vpop.f32.mrf.mxu0 }
 0x162   : > { %v4668_v54 = vadd.f32 %v1490_v53, %v1323_v11  ;;  %v2361_v47 = vsel %vm2317_vm12, %v2351_v2, %v2360_v38  ;;  %v2093_v53 = vunpack.c.h.b16 %v4666_v51 }
 0x163   : > { %v1066_v55 = vpop.f32.mrf.mxu2 }
 0x164   : > { %v1110_v57 = vadd.f32 %v1066_v55, %v4637_v3  ;;  %v4672_v62 = vpop.f32.mrf.mxu1  ;;  %v2363_v55 = vshrl.u32 %v4019_v48, 16  ;;  %v2100_v0 = vpack.c.b16 %v2093_v53, %v2093_v53 }
 0x166   : > { %v1324_v63 = vadd.f32 %v1280_v52, %v1110_v57  ;;  %v1898_v52 = vsel %vm1887_vm11, %v1895_v10, %v1897_v46  ;;  %v1836_v57 = vld [vmem:[#allocation2 + $0x34] sm:$0xf]  ;;  %v2365_v2 = vrot.slane %v2363_v55, 2  ;;  %v2112_v51 = vrot.slane %v2100_v0, 2  ;;  %v4031_v55 = vld [vmem:[#allocation2 + $0x18] sm:$0xff] }
 0x167   : > { %1770 = vmatmul.bf16.gmra.mxu1 %v1677_v1 }
 0x168   : > { %v1282_v5 = vpop.f32.mrf.mxu3  ;;  %v2113_v15 = vsel %vm1887_vm11, %v2110_v42, %v2112_v51 }
 0x169   : > { %v1493_v3 = vpop.f32.mrf.mxu0 }
 0x16a   : > { %v4678_v8 = vadd.f32 %v1493_v3, %v1324_v63  ;;  %v1879_v63 = vunpack.c.l.b16 %v1836_v57  ;;  %v2369_v3 = vor.u32 %v2368_v4, %v2365_v2 }
 0x16b   : > { %v1068_v9 = vpop.f32.mrf.mxu2 }
 0x16c   : > { %v1111_v12 = vadd.f32 %v1068_v9, %v4645_v21  ;;  %2453 = vmatmul.bf16.gmra.mxu0 %v2352_v13  ;;  %v4683_v20 = vpop.f32.mrf.mxu1  ;;  %v1886_v7 = vpack.c.b16 %v1879_v63, %v1879_v63 }
 0x16d   : > { %2192 = vmatmul.bf16.gmra.mxu3 %v2109_v17 }
 0x16e   : > { %v1325_v22 = vadd.f32 %v1282_v5, %v1111_v12  ;;  %v1899_v14 = vrot.slane %v1886_v7, 2  ;;  %v4032_v7 = vld [vmem:[#allocation2 + $0x20] sm:$0xff] }
 0x170   : > { %1979 = vmatmul.bf16.gmra.mxu2 %v1896_v19  ;;  %v1285_v21 = vpop.f32.mrf.mxu3  ;;  %v4029_v19 = vld [vmem:[#allocation2 + $0x8] sm:$0xf0] }
 0x171   : > { %v1495_v27 = vpop.f32.mrf.mxu0 }
 0x172   : > { %v4686_v28 = vadd.f32 %v1495_v27, %v1325_v22  ;;  %v1900_v22 = vsel %vm1887_vm11, %v1897_v46, %v1899_v14 }
 0x173   : > { %v1071_v29 = vpop.f32.mrf.mxu2 }
 0x174   : > { %v1112_v30 = vadd.f32 %v1071_v29, %v4649_v18  ;;  %v4689_v41 = vpop.f32.mrf.mxu1  ;;  %v3812_v29 = vld [vmem:[#allocation2 + $0x8] sm:$0x8] }
 0x176   : > { %v1326_v35 = vadd.f32 %v1285_v21, %v1112_v30 }
 0x177   : > { %1775 = vmatmul.bf16.gmra.mxu1 %v1686_v37  ;;  %v2374_v37 = vrot.slane %v2372_v39, 2 }
 0x178   : > { %v1287_v40 = vpop.f32.mrf.mxu3 }
 0x179   : > { %v1498_v43 = vpop.f32.mrf.mxu0 }
 0x17a   : > { %v4692_v44 = vadd.f32 %v1498_v43, %v1326_v35 }
 0x17b   : > { %v1073_v11 = vpop.f32.mrf.mxu2 }
 0x17c   : > { %v1113_v18 = vadd.f32 %v1073_v11, %v4663_v45  ;;  %2458 = vmatmul.bf16.gmra.mxu0 %v2361_v47  ;;  %v4697_v50 = vpop.f32.mrf.mxu1 }
 0x17d   : > { %2197 = vmatmul.bf16.gmra.mxu3 %v2111_v49 }
 0x17e   : > { %v1327_v59 = vadd.f32 %v1287_v40, %v1113_v18 }
 0x180   : > { %1984 = vmatmul.bf16.gmra.mxu2 %v1898_v52  ;;  %v1290_v58 = vpop.f32.mrf.mxu3 }
 0x181   : > { %v1500_v45 = vpop.f32.mrf.mxu0 }
 0x182   : > { %v4701_v60 = vadd.f32 %v1500_v45, %v1327_v59 }
 0x183   : > { %v1076_v61 = vpop.f32.mrf.mxu2 }
 0x184   : > { %v1114_v1 = vadd.f32 %v1076_v61, %v4672_v62  ;;  %v856_v5 = vpop.f32.mrf.mxu1  ;;  %v2370_v62 = vsel %vm2317_vm12, %v2360_v38, %v2369_v3  ;;  %v2586_v61 = vrot.slane %v4031_v55, 3 }
 0x186   : > { %v1328_v6 = vadd.f32 %v1290_v58, %v1114_v1  ;;  %v2587_v1 = vsel %vm526_vm4, %v2584_v36, %v2586_v61 }
 0x187   : > { %1780 = vmatmul.bf16.gmra.mxu1 %v1685_v31  ;;  %v3813_v31 = vor.u32 %v4029_v19, %v3812_v29 }
 0x188   : > { %v1292_v9 = vpop.f32.mrf.mxu3 }
 0x189   : > { %v1503_v10 = vpop.f32.mrf.mxu0  ;;  %v2583_v42 = vrot.slane %v3813_v31, 3 }
 0x18a   : > { %v4704_v12 = vadd.f32 %v1503_v10, %v1328_v6 }
 0x18b   : > { %v1078_v13 = vpop.f32.mrf.mxu2  ;;  %v2585_v46 = vsel %vm526_vm4, %v2583_v42, %v2584_v36 }
 0x18c   : > { %v1115_v16 = vadd.f32 %v1078_v13, %v4683_v20  ;;  %2463 = vmatmul.bf16.gmra.mxu0 %v2370_v62  ;;  %v858_v17 = vpop.f32.mrf.mxu1  ;;  %v2375_v20 = vshll.u32 %v3761_v26, 16 }
 0x18d   : > { %2202 = vmatmul.bf16.gmra.mxu3 %v2113_v15 }
 0x18e   : > { %v1329_v27 = vadd.f32 %v1292_v9, %v1115_v16  ;;  %v2377_v38 = vrot.slane %v2375_v20, 3 }
 0x190   : > { %1989 = vmatmul.bf16.gmra.mxu2 %v1900_v22  ;;  %v1295_v21 = vpop.f32.mrf.mxu3  ;;  %v2378_v11 = vor.u32 %v2377_v38, %v2374_v37 }
 0x191   : > { %v1505_v30 = vpop.f32.mrf.mxu0 }
 0x192   : > { %v4710_v32 = vadd.f32 %v1505_v30, %v1329_v27  ;;  %v2379_v48 = vsel %vm2317_vm12, %v2369_v3, %v2378_v11  ;;  %v4108_v27 = vld [vmem:[%s4285_s27 + $0x8] sm:$0xff] }
 0x193   : > { %v1081_v33 = vpop.f32.mrf.mxu2 }
 0x194   : > { %v1116_v35 = vadd.f32 %v1081_v33, %v4689_v41  ;;  %v861_v40 = vpop.f32.mrf.mxu1 }
 0x195   : > { %877 = vst [vmem:[#allocation3 + $0x40] sm:$0xf] %v861_v40 }
 0x196   : > { %v1330_v43 = vadd.f32 %v1295_v21, %v1116_v35  ;;  %v4033_v21 = vld [vmem:[#allocation2 + $0x28] sm:$0xff] }
 0x197   : > { %2659 = vmatmul.bf16.vlgmr.msra.gmra.mxu1 %v2585_v46  ;;  %v2590_v39 = vrot.slane %v4033_v21, 3 }
 0x198   : > { %v1297_v18 = vpop.f32.mrf.mxu3 }
 0x199   : > { %v1508_v47 = vpop.f32.mrf.mxu0 }
 0x19a   : > { %v4715_v49 = vadd.f32 %v1508_v47, %v1330_v43 }
 0x19b   : > { %v1083_v52 = vpop.f32.mrf.mxu2 }
 0x19c   : > { %v1117_v41 = vadd.f32 %v1083_v52, %v4697_v50  ;;  %2468 = vmatmul.bf16.gmra.mxu0 %v2379_v48  ;;  %v863_v53 = vpop.f32.mrf.mxu1  ;;  %v1107_v13 = vld [vmem:[#allocation3 + $0x40] sm:$0xf]  ;;  %v4034_v48 = vld [vmem:[#allocation2 + $0x30] sm:$0xff]  ;;  %v4109_v52 = vld [vmem:[%s4285_s27 + $0x10] sm:$0xff] }
 0x19d   : > { %2207 = vmatmul.bf16.gmra.mxu3 %v2112_v51  ;;  %v4107_v51 = vld [vmem:[%s4285_s27] sm:$0xff]  ;;  %v4049_v53 = vld [vmem:[%s4909_s5 + $0x28] sm:$0xff] }
 0x19e   : > { %v1331_v57 = vadd.f32 %v1297_v18, %v1117_v41 }
 0x1a0   : > { %1994 = vmatmul.bf16.gmra.mxu2 %v1899_v14  ;;  %v1300_v56 = vpop.f32.mrf.mxu3 }
 0x1a1   : > { %v1510_v58 = vpop.f32.mrf.mxu0 }
 0x1a2   : > { %v4718_v59 = vadd.f32 %v1510_v58, %v1331_v57 }
 0x1a3   : > { %v1086_v45 = vpop.f32.mrf.mxu2 }
 0x1a4   : > { %v1751_v63 = vpop.f32.mrf.mxu1  ;;  %v2592_v45 = vrot.slane %v4034_v48, 3 }
 0x1a5   : > { %v1798_v0 = vadd.f32 %v1751_v63, %v4658_v34  ;;  %v2588_v34 = vrot.slane %v4032_v7, 3 }
 0x1a7   : > { %2664 = vmatmul.bf16.gmra.mxu1 %v2587_v1  ;;  %v2589_v62 = vsel %vm526_vm4, %v2586_v61, %v2588_v34  ;;  %v2591_v38 = vsel %vm526_vm4, %v2588_v34, %v2590_v39 }
 0x1a8   : > { %v1302_v50 = vpop.f32.mrf.mxu3 }
 0x1a9   : > { %v1513_v2 = vpop.f32.mrf.mxu0 }
 0x1ab   : > { %v1088_v4 = vpop.f32.mrf.mxu2 }
 0x1ac   : > { %2473 = vmatmul.bf16.gmra.mxu0 %v2378_v11  ;;  %v1753_v5 = vpop.f32.mrf.mxu1 }
 0x1ad   : > { %v1799_v6 = vadd.f32 %v1753_v5, %v4668_v54  ;;  %v4051_v54 = vld [vmem:[%s4909_s5 + $0x38] sm:$0xff]  ;;  %v3836_v5 = vld [vmem:[#allocation2 + $0x38] sm:$0xf] }
 0x1ae   : > { %3071 = vmatpush.bf16.msra.mxu3 %v4051_v54 }
 0x1b0   : > { %3870 = vmatmul.msk.bf16.vlgmr.msra.gmra.mxu2 %vm365_vm1, %v4107_v51  ;;  %v1305_v3 = vpop.f32.mrf.mxu3 }
 0x1b1   : > { %v1515_v9 = vpop.f32.mrf.mxu0 }
 0x1b3   : > { %v1091_v10 = vpop.f32.mrf.mxu2 }
 0x1b4   : > { %v1120_v14 = vadd.f32 %v1107_v13, %v1091_v10  ;;  %v1756_v15 = vpop.f32.mrf.mxu1  ;;  %v4110_v13 = vld [vmem:[%s4285_s27 + $0x18] sm:$0xff]  ;;  %s4127_s27 = scalar_lea.hbm %s4126_s29, 64 }
 0x1b5   : > { %v1800_v16 = vadd.f32 %v1756_v15, %v4678_v8  ;;  %p4128_p11 = scmp.ne.s32.totalorder %s4126_s29, %s4127_s27  ;;  %p4133_p1 = scmp.lt.s32.totalorder %s4131_s22, %s4127_s27 }
 0x1b6   : > { %1133 = vst [vmem:[#allocation3 + $0x40] sm:$0xf] %v1120_v14 }
 0x1b7   : > { %2669 = vmatmul.bf16.gmra.mxu1 %v2589_v62  ;;  %p4129_p12 = pnand %p4128_p11, %p4266_p5  ;;  %p4134_p2 = por %p4133_p1, %p4132_p0 }
 0x1b8   : > { %v1307_v17 = vpop.f32.mrf.mxu3 }
 0x1b9   : > { %v1518_v22 = vpop.f32.mrf.mxu0  ;;  %p4130_p13 = pneg %p4129_p12 }
 0x1bb   : > { %v1093_v19 = vpop.f32.mrf.mxu2  ;;  %p4135_p3 = pnand %p4134_p2, %p4130_p13 }
 0x1bc   : > { %v1758_v25 = vpop.f32.mrf.mxu1 }
 0x1bd   : > { %v1321_v23 = vld [vmem:[#allocation3 + $0x40] sm:$0xf]  ;;  %v1801_v26 = vadd.f32 %v1758_v25, %v4686_v28  ;;  %v4050_v28 = vld [vmem:[%s4909_s5 + $0x30] sm:$0xff] }
 0x1be   : > { %v1334_v24 = vadd.f32 %v1321_v23, %v1305_v3  ;;  %3072 = vmatpush.bf16.msra.mxu3 %v4050_v28 }
 0x1c0   : > { %1347 = vst [vmem:[#allocation3 + $0x40] sm:$0xf] %v1334_v24  ;;  %3871 = vmatmul.msk.bf16.gmra.mxu2 %vm365_vm1, %v4108_v27  ;;  %v2178_v8 = vpop.f32.mrf.mxu3 }
 0x1c1   : > { %v1520_v29 = vpop.f32.mrf.mxu0 }
 0x1c2   : > { %3073 = vmatpush.bf16.msra.mxu3 %v4049_v53  ;;  %v4047_v29 = vld [vmem:[%s4909_s5 + $0x18] sm:$0xff] }
 0x1c3   : > { %v1965_v30 = vpop.f32.mrf.mxu2 }
 0x1c4   : > { %v2012_v31 = vadd.f32 %v1965_v30, %v1798_v0  ;;  %v1761_v20 = vpop.f32.mrf.mxu1  ;;  %v2593_v0 = vsel %vm526_vm4, %v2590_v39, %v2592_v45 }
 0x1c5   : > { %v1802_v36 = vadd.f32 %v1761_v20, %v4692_v44 }
 0x1c6   : > { %v2225_v33 = vadd.f32 %v2178_v8, %v2012_v31 }
 0x1c7   : > { %v1534_v35 = vld [vmem:[#allocation3 + $0x40] sm:$0xf]  ;;  %2674 = vmatmul.bf16.gmra.mxu1 %v2591_v38 }
 0x1c8   : > { %v1547_v37 = vadd.f32 %v1534_v35, %v1518_v22  ;;  %v2180_v40 = vpop.f32.mrf.mxu3 }
 0x1c9   : > { %v2444_v42 = vpop.f32.mrf.mxu0 }
 0x1ca   : > { %1560 = vst [vmem:[#allocation3 + $0x40] sm:$0xf] %v1547_v37  ;;  %v4738_v43 = vadd.f32 %v2444_v42, %v2225_v33 }
 0x1cb   : > { %v1967_v11 = vpop.f32.mrf.mxu2 }
 0x1cc   : > { %v2013_v46 = vadd.f32 %v1967_v11, %v1799_v6  ;;  %v1763_v18 = vpop.f32.mrf.mxu1  ;;  %v4035_v6 = vld [vmem:[#allocation2 + $0x38] sm:$0x10] }
 0x1cd   : > { %v1803_v44 = vadd.f32 %v1763_v18, %v4701_v60  ;;  %v3837_v9 = vor.u32 %v4035_v6, %v3836_v5 }
 0x1ce   : > { %v2226_v47 = vadd.f32 %v2180_v40, %v2013_v46 }
 0x1cf   : > { %v2594_v15 = vrot.slane %v3837_v9, 3 }
 0x1d0   : > { %3872 = vmatmul.msk.bf16.gmra.mxu2 %vm365_vm1, %v4109_v52  ;;  %v2183_v41 = vpop.f32.mrf.mxu3 }
 0x1d1   : > { %v2446_v55 = vpop.f32.mrf.mxu0  ;;  %v2595_v22 = vsel %vm526_vm4, %v2592_v45, %v2594_v15 }
 0x1d2   : > { %v4746_v56 = vadd.f32 %v2446_v55, %v2226_v47 }
 0x1d3   : > { %v1970_v57 = vpop.f32.mrf.mxu2 }
 0x1d4   : > { %v2014_v58 = vadd.f32 %v1970_v57, %v1800_v16  ;;  %v1766_v61 = vpop.f32.mrf.mxu1 }
 0x1d5   : > { %v1804_v60 = vadd.f32 %v1766_v61, %v4704_v12  ;;  %v4048_v12 = vld [vmem:[%s4909_s5 + $0x20] sm:$0xff] }
 0x1d6   : > { %v2227_v63 = vadd.f32 %v2183_v41, %v2014_v58  ;;  %3074 = vmatpush.bf16.msra.mxu3 %v4048_v12  ;;  %v1797_v41 = vld [vmem:[#allocation3 + $0x40] sm:$0xf]  ;;  %v4046_v58 = vld [vmem:[%s4909_s5 + $0x10] sm:$0xff] }
 0x1d7   : > { %2679 = vmatmul.bf16.gmra.mxu1 %v2593_v0  ;;  %v4045_v0 = vld [vmem:[%s4909_s5 + $0x8] sm:$0xff] }
 0x1d8   : > { %v2185_v1 = vpop.f32.mrf.mxu3 }
 0x1d9   : > { %v2449_v50 = vpop.f32.mrf.mxu0 }
 0x1da   : > { %v4750_v2 = vadd.f32 %v2449_v50, %v2227_v63  ;;  %3075 = vmatpush.bf16.msra.mxu3 %v4047_v29 }
 0x1db   : > { %v1972_v4 = vpop.f32.mrf.mxu2 }
 0x1dc   : > { %v2015_v7 = vadd.f32 %v1972_v4, %v1801_v26  ;;  %v1768_v51 = vpop.f32.mrf.mxu1 }
 0x1dd   : > { %v1805_v10 = vadd.f32 %v1768_v51, %v4710_v32 }
 0x1de   : > { %v2228_v3 = vadd.f32 %v2185_v1, %v2015_v7  ;;  %3076 = vmatpush.bf16.msra.mxu3 %v4046_v58  ;;  %v4787_v7 = vld [vmem:[%s4908_s4] ss:$0 sm:$0xff] }
 0x1df   : > { %v4794_v12 = vrot.slane %v4787_v7, 4 }
 0x1e0   : > { %3873 = vmatmul.msk.bf16.gmra.mxu2 %vm365_vm1, %v4110_v13  ;;  %v2188_v14 = vpop.f32.mrf.mxu3  ;;  %v4797_v13 = vrot.slane %v4787_v7, 6 }
 0x1e1   : > { %v2451_v34 = vpop.f32.mrf.mxu0 }
 0x1e2   : > { %v4758_v16 = vadd.f32 %v2451_v34, %v2228_v3  ;;  %3077 = vmatpush.bf16.msra.mxu3 %v4045_v0 }
 0x1e3   : > { %v1975_v62 = vpop.f32.mrf.mxu2 }
 0x1e4   : > { %v2016_v17 = vadd.f32 %v1975_v62, %v1802_v36  ;;  %v1771_v54 = vpop.f32.mrf.mxu1 }
 0x1e5   : > { %v1806_v32 = vadd.f32 %v1771_v54, %v4715_v49 }
 0x1e6   : > { %v2229_v19 = vadd.f32 %v2188_v14, %v2016_v17 }
 0x1e7   : > { %2684 = vmatmul.bf16.gmra.mxu1 %v2595_v22 }
 0x1e8   : > { %v2190_v23 = vpop.f32.mrf.mxu3 }
 0x1e9   : > { %v2454_v24 = vpop.f32.mrf.mxu0 }
 0x1ea   : > { %v4762_v25 = vadd.f32 %v2454_v24, %v2229_v19 }
 0x1eb   : > { %v1977_v26 = vpop.f32.mrf.mxu2 }
 0x1ec   : > { %v2017_v21 = vadd.f32 %v1977_v26, %v1803_v44  ;;  %v1773_v27 = vpop.f32.mrf.mxu1 }
 0x1ed   : > { %v1807_v30 = vadd.f32 %v1773_v27, %v4718_v59  ;;  %v4044_v27 = vld [vmem:[%s4909_s5] sm:$0xff] }
 0x1ee   : > { %v2230_v8 = vadd.f32 %v2190_v23, %v2017_v21  ;;  %3078 = vmatpush.bf16.msra.mxu3 %v4044_v27 }
 0x1f0   : > { %v2193_v31 = vpop.f32.mrf.mxu3 }
 0x1f1   : > { %v2456_v39 = vpop.f32.mrf.mxu0 }
 0x1f2   : > { %v4768_v20 = vadd.f32 %v2456_v39, %v2230_v8 }
 0x1f3   : > { %v1980_v49 = vpop.f32.mrf.mxu2 }
 0x1f4   : > { %v2018_v33 = vadd.f32 %v1980_v49, %v1804_v60  ;;  %v1776_v35 = vpop.f32.mrf.mxu1 }
 0x1f6   : > { %v2231_v36 = vadd.f32 %v2193_v31, %v2018_v33 }
 0x1f7   : > { %2689 = vmatmul.bf16.gmra.mxu1 %v2594_v15 }
 0x1f8   : > { %v2195_v28 = vpop.f32.mrf.mxu3 }
 0x1f9   : > { %v2459_v37 = vpop.f32.mrf.mxu0 }
 0x1fa   : > { %v4770_v38 = vadd.f32 %v2459_v37, %v2231_v36 }
 0x1fb   : > { %v1982_v40 = vpop.f32.mrf.mxu2 }
 0x1fc   : > { %v2019_v42 = vadd.f32 %v1982_v40, %v1805_v10  ;;  %v1778_v11 = vpop.f32.mrf.mxu1  ;;  %v4791_v10 = vrot.slane %v4787_v7, 2 }
 0x1fe   : > { %v2232_v46 = vadd.f32 %v2195_v28, %v2019_v42 }
 0x200   : > { %v2198_v18 = vpop.f32.mrf.mxu3 }
 0x201   : > { %v2461_v59 = vpop.f32.mrf.mxu0 }
 0x202   : > { %v4772_v47 = vadd.f32 %v2461_v59, %v2232_v46 }
 0x203   : > { %v1985_v44 = vpop.f32.mrf.mxu2 }
 0x204   : > { %v2020_v48 = vadd.f32 %v1985_v44, %v1806_v32  ;;  %v1781_v52 = vpop.f32.mrf.mxu1 }
 0x205   : > { %v1810_v55 = vadd.f32 %v1797_v41, %v1781_v52 }
 0x206   : > { %v2233_v53 = vadd.f32 %v2198_v18, %v2020_v48 }
 0x207   : > { %1823 = vst [vmem:[#allocation3 + $0x40] sm:$0xf] %v1810_v55 }
 0x208   : > { %v2200_v57 = vpop.f32.mrf.mxu3 }
 0x209   : > { %v2464_v45 = vpop.f32.mrf.mxu0 }
 0x20a   : > { %v4777_v61 = vadd.f32 %v2464_v45, %v2233_v53 }
 0x20b   : > { %v1987_v63 = vpop.f32.mrf.mxu2 }
 0x20c   : > { %v2021_v60 = vadd.f32 %v1987_v63, %v1807_v30  ;;  %v1783_v1 = vpop.f32.mrf.mxu1 }
 0x20e   : > { %v2234_v50 = vadd.f32 %v2200_v57, %v2021_v60  ;;  %v2011_v40 = vld [vmem:[#allocation3 + $0x40] sm:$0xf] }
 0x210   : > { %v2203_v4 = vpop.f32.mrf.mxu3 }
 0x211   : > { %v2466_v5 = vpop.f32.mrf.mxu0 }
 0x212   : > { %v4782_v6 = vadd.f32 %v2466_v5, %v2234_v50 }
 0x213   : > { %v1990_v51 = vpop.f32.mrf.mxu2 }
 0x214   : > { %v2660_v3 = vpop.f32.mrf.mxu1 }
 0x215   : > { %v2707_v9 = vadd.f32 %v2660_v3, %v4738_v43 }
 0x217   : > { %v2753_v14 = vrot.slane %v2707_v9, 2  ;;  %v2754_v34 = vrot.slane %v2707_v9, 4  ;;  %v2755_v15 = vrot.slane %v2707_v9, 6  ;;  %v2811_v62 = vadd.f32 %v4787_v7, %v2707_v9 }
 0x218   : > { %v2205_v17 = vpop.f32.mrf.mxu3 }
 0x219   : > { %v2469_v54 = vpop.f32.mrf.mxu0  ;;  %v2812_v22 = vadd.f32 %v4791_v10, %v2753_v14  ;;  %v2813_v43 = vadd.f32 %v4794_v12, %v2754_v34  ;;  %v2814_v19 = vadd.f32 %v4797_v13, %v2755_v15  ;;  %v2843_v32 = vmax.f32 %v2811_v62, 0.0 }
 0x21b   : > { %v1992_v23 = vpop.f32.mrf.mxu2  ;;  %v2844_v24 = vmax.f32 %v2812_v22, 0.0  ;;  %v2845_v26 = vmax.f32 %v2813_v43, 0.0  ;;  %v2846_v21 = vmax.f32 %v2814_v19, 0.0  ;;  %2907 = vst [vmem:[#allocation1] ss:$4 sm:$0xff] %v2843_v32 }
 0x21c   : > { %v2662_v8 = vpop.f32.mrf.mxu1 }
 0x21d   : > { %2909 = vst [vmem:[#allocation1 + $0x1] ss:$4 sm:$0xff] %v2844_v24  ;;  %v2708_v29 = vadd.f32 %v2662_v8, %v4746_v56 }
 0x21e   : > { %2911 = vst [vmem:[#allocation1 + $0x2] ss:$4 sm:$0xff] %v2845_v26 }
 0x21f   : > { %2913 = vst [vmem:[#allocation1 + $0x3] ss:$4 sm:$0xff] %v2846_v21  ;;  %v2756_v30 = vrot.slane %v2708_v29, 2  ;;  %v2757_v31 = vrot.slane %v2708_v29, 4  ;;  %v2758_v39 = vrot.slane %v2708_v29, 6 }
 0x220   : > { %v2208_v49 = vpop.f32.mrf.mxu3 }
 0x221   : > { %v2471_v33 = vpop.f32.mrf.mxu0  ;;  %v2815_v35 = vadd.f32 %v4787_v7, %v2756_v30  ;;  %v2816_v36 = vadd.f32 %v4791_v10, %v2757_v31  ;;  %v2817_v28 = vadd.f32 %v4794_v12, %v2758_v39 }
 0x223   : > { %v1995_v37 = vpop.f32.mrf.mxu2  ;;  %v2847_v11 = vmax.f32 %v2815_v35, 0.0  ;;  %v2848_v46 = vmax.f32 %v2816_v36, 0.0  ;;  %v2849_v56 = vmax.f32 %v2817_v28, 0.0 }
 0x224   : > { %v2024_v42 = vadd.f32 %v2011_v40, %v1995_v37  ;;  %v2665_v18 = vpop.f32.mrf.mxu1 }
 0x225   : > { %2915 = vst [vmem:[#allocation1 + $0x20] ss:$4 sm:$0xff] %v2847_v11  ;;  %v2709_v59 = vadd.f32 %v2665_v18, %v4750_v2 }
 0x226   : > { %2037 = vst [vmem:[#allocation3 + $0x40] sm:$0xf] %v2024_v42  ;;  %v2922_v50 = vld.sshfl [vmem:[#allocation1] sm:$0xff pattern:$0x73625140] }
 0x227   : > { %2917 = vst [vmem:[#allocation1 + $0x21] ss:$4 sm:$0xff] %v2848_v46  ;;  %v2759_v44 = vrot.slane %v2709_v59, 4  ;;  %v2760_v48 = vrot.slane %v2709_v59, 6  ;;  %v2818_v52 = vadd.f32 %v4797_v13, %v2709_v59 }
 0x228   : > { %2919 = vst [vmem:[#allocation1 + $0x22] ss:$4 sm:$0xff] %v2849_v56  ;;  %v2210_v41 = vpop.f32.mrf.mxu3 }
 0x229   : > { %v2474_v53 = vpop.f32.mrf.mxu0  ;;  %v2819_v55 = vadd.f32 %v4787_v7, %v2759_v44  ;;  %v2820_v57 = vadd.f32 %v4791_v10, %v2760_v48  ;;  %v2850_v58 = vmax.f32 %v2818_v52, 0.0 }
 0x22b   : > { %v1997_v45 = vpop.f32.mrf.mxu2  ;;  %v2851_v63 = vmax.f32 %v2819_v55, 0.0  ;;  %2921 = vst [vmem:[#allocation1 + $0x23] ss:$4 sm:$0xff] %v2850_v58  ;;  %v2852_v0 = vmax.f32 %v2820_v57, 0.0 }
 0x22c   : > { %v2667_v1 = vpop.f32.mrf.mxu1 }
 0x22d   : > { %v2224_v60 = vld [vmem:[#allocation3 + $0x40] sm:$0xf]  ;;  %v2710_v4 = vadd.f32 %v2667_v1, %v4758_v16  ;;  %2924 = vst [vmem:[#allocation1] ss:$4 sm:$0xff] %v2851_v63 }
 0x22e   : > { %v2237_v2 = vadd.f32 %v2224_v60, %v2208_v49  ;;  %2925 = vst [vmem:[#allocation1 + $0x1] ss:$4 sm:$0xff] %v2852_v0 }
 0x22f   : > { %v2761_v5 = vrot.slane %v2710_v4, 2  ;;  %v2762_v51 = vrot.slane %v2710_v4, 6  ;;  %v2821_v3 = vadd.f32 %v4794_v12, %v2710_v4 }
 0x230   : > { %2250 = vst [vmem:[#allocation3 + $0x40] sm:$0xf] %v2237_v2 }
 0x231   : > { %v2476_v9 = vpop.f32.mrf.mxu0  ;;  %v2822_v14 = vadd.f32 %v4797_v13, %v2761_v5  ;;  %v2823_v34 = vadd.f32 %v4787_v7, %v2762_v51  ;;  %v2853_v15 = vmax.f32 %v2821_v3, 0.0 }
 0x232   : > { %v2923_v62 = vld.sshfl [vmem:[#allocation1 + $0x20] sm:$0xff pattern:$0x73625140] }
 0x233   : > { %v2854_v17 = vmax.f32 %v2822_v14, 0.0  ;;  %v2855_v54 = vmax.f32 %v2823_v34, 0.0  ;;  %v2962_v22 = vpack.c.bf16 %v2923_v62, %v2922_v50  ;;  %2926 = vst [vmem:[#allocation1 + $0x2] ss:$4 sm:$0xff] %v2853_v15 }
 0x234   : > { %v2670_v43 = vpop.f32.mrf.mxu1 }
 0x235   : > { %v2711_v16 = vadd.f32 %v2670_v43, %v4762_v25  ;;  %3079 = vmatmul.bf16.vlgmr.msra.gmra.mxu3 %v2962_v22  ;;  %2927 = vst [vmem:[#allocation1 + $0x3] ss:$4 sm:$0xff] %v2854_v17 }
 0x236   : > { %2928 = vst [vmem:[#allocation1 + $0x20] ss:$4 sm:$0xff] %v2855_v54 }
 0x237   : > { %v2490_v19 = vld [vmem:[#allocation3 + $0x40] sm:$0xf]  ;;  %v2763_v23 = vrot.slane %v2711_v16, 2  ;;  %v2764_v24 = vrot.slane %v2711_v16, 4  ;;  %v2824_v26 = vadd.f32 %v4791_v10, %v2711_v16 }
 0x238   : > { %v2503_v32 = vadd.f32 %v2490_v19, %v2474_v53 }
 0x239   : > { %v2825_v21 = vadd.f32 %v4794_v12, %v2763_v23  ;;  %v2826_v27 = vadd.f32 %v4797_v13, %v2764_v24  ;;  %v2856_v8 = vmax.f32 %v2824_v26, 0.0 }
 0x23a   : > { %2516 = vst [vmem:[#allocation3 + $0x40] sm:$0xf] %v2503_v32 }
 0x23b   : > { %v2857_v29 = vmax.f32 %v2825_v21, 0.0  ;;  %v2858_v30 = vmax.f32 %v2826_v27, 0.0  ;;  %2929 = vst [vmem:[#allocation1 + $0x21] ss:$4 sm:$0xff] %v2856_v8 }
 0x23c   : > { %v2672_v31 = vpop.f32.mrf.mxu1  ;;  %v2932_v42 = vld.sshfl [vmem:[#allocation1] sm:$0xff pattern:$0x73625140] }
 0x23d   : > { %v2712_v25 = vadd.f32 %v2672_v31, %v4768_v20  ;;  %2930 = vst [vmem:[#allocation1 + $0x22] ss:$4 sm:$0xff] %v2857_v29 }
 0x23e   : > { %2931 = vst [vmem:[#allocation1 + $0x23] ss:$4 sm:$0xff] %v2858_v30 }
 0x23f   : > { %v2765_v39 = vrot.slane %v2712_v25, 2  ;;  %v2766_v49 = vrot.slane %v2712_v25, 4  ;;  %v2767_v33 = vrot.slane %v2712_v25, 6  ;;  %v2827_v35 = vadd.f32 %v4787_v7, %v2712_v25 }
 0x241   : > { %v2828_v36 = vadd.f32 %v4791_v10, %v2765_v39  ;;  %v2829_v28 = vadd.f32 %v4794_v12, %v2766_v49  ;;  %v2830_v37 = vadd.f32 %v4797_v13, %v2767_v33  ;;  %v2859_v40 = vmax.f32 %v2827_v35, 0.0 }
 0x243   : > { %v2860_v11 = vmax.f32 %v2828_v36, 0.0  ;;  %v2861_v46 = vmax.f32 %v2829_v28, 0.0  ;;  %2934 = vst [vmem:[#allocation1] ss:$4 sm:$0xff] %v2859_v40  ;;  %v2862_v56 = vmax.f32 %v2830_v37, 0.0 }
 0x244   : > { %v2675_v20 = vpop.f32.mrf.mxu1  ;;  %v4105_v36 = vld [vmem:[%s4912_s8] ss:$0 sm:$0xff] }
 0x245   : > { %v2713_v18 = vadd.f32 %v2675_v20, %v4770_v38  ;;  %v2933_v59 = vld.sshfl [vmem:[#allocation1 + $0x20] sm:$0xff pattern:$0x73625140]  ;;  %2935 = vst [vmem:[#allocation1 + $0x1] ss:$4 sm:$0xff] %v2860_v11 }
 0x246   : > { %v2963_v44 = vpack.c.bf16 %v2933_v59, %v2932_v42  ;;  %2936 = vst [vmem:[#allocation1 + $0x2] ss:$4 sm:$0xff] %v2861_v46  ;;  %v4106_v28 = vld [vmem:[%s4910_s6] ss:$0 sm:$0xff] }
 0x247   : > { %v2768_v48 = vrot.slane %v2713_v18, 2  ;;  %v2769_v52 = vrot.slane %v2713_v18, 4  ;;  %v2770_v41 = vrot.slane %v2713_v18, 6  ;;  %2937 = vst [vmem:[#allocation1 + $0x3] ss:$4 sm:$0xff] %v2862_v56 }
 0x248   : > { %3084 = vmatmul.bf16.gmra.mxu3 %v2963_v44 }
 0x249   : > { %v2831_v53 = vadd.f32 %v4787_v7, %v2768_v48  ;;  %v2832_v55 = vadd.f32 %v4791_v10, %v2769_v52  ;;  %v2833_v57 = vadd.f32 %v4794_v12, %v2770_v41 }
 0x24b   : > { %v2863_v58 = vmax.f32 %v2831_v53, 0.0  ;;  %v2864_v45 = vmax.f32 %v2832_v55, 0.0  ;;  %v2865_v63 = vmax.f32 %v2833_v57, 0.0 }
 0x24c   : > { %v2677_v60 = vpop.f32.mrf.mxu1 }
 0x24d   : > { %v2714_v38 = vadd.f32 %v2677_v60, %v4772_v47  ;;  %2938 = vst [vmem:[#allocation1 + $0x20] ss:$4 sm:$0xff] %v2863_v58 }
 0x24e   : > { %2939 = vst [vmem:[#allocation1 + $0x21] ss:$4 sm:$0xff] %v2864_v45  ;;  %v2942_v14 = vld.sshfl [vmem:[#allocation1] sm:$0xff pattern:$0x73625140] }
 0x24f   : > { %v2771_v0 = vrot.slane %v2714_v38, 4  ;;  %v2772_v1 = vrot.slane %v2714_v38, 6  ;;  %v2834_v2 = vadd.f32 %v4797_v13, %v2714_v38  ;;  %2940 = vst [vmem:[#allocation1 + $0x22] ss:$4 sm:$0xff] %v2865_v63 }
 0x251   : > { %v2835_v50 = vadd.f32 %v4787_v7, %v2771_v0  ;;  %v2836_v4 = vadd.f32 %v4791_v10, %v2772_v1  ;;  %v2866_v5 = vmax.f32 %v2834_v2, 0.0 }
 0x253   : > { %v2867_v51 = vmax.f32 %v2835_v50, 0.0  ;;  %v2868_v3 = vmax.f32 %v2836_v4, 0.0  ;;  %2941 = vst [vmem:[#allocation1 + $0x23] ss:$4 sm:$0xff] %v2866_v5 }
 0x254   : > { %v2680_v9 = vpop.f32.mrf.mxu1 }
 0x255   : > { %v2715_v34 = vadd.f32 %v2680_v9, %v4777_v61  ;;  %2944 = vst [vmem:[#allocation1] ss:$4 sm:$0xff] %v2867_v51 }
 0x256   : > { %2945 = vst [vmem:[#allocation1 + $0x1] ss:$4 sm:$0xff] %v2868_v3 }
 0x257   : > { %v2773_v47 = vrot.slane %v2715_v34, 2  ;;  %v2774_v15 = vrot.slane %v2715_v34, 6  ;;  %v2837_v62 = vadd.f32 %v4794_v12, %v2715_v34 }
 0x259   : > { %v2838_v17 = vadd.f32 %v4797_v13, %v2773_v47  ;;  %v2839_v54 = vadd.f32 %v4787_v7, %v2774_v15  ;;  %v2869_v22 = vmax.f32 %v2837_v62, 0.0 }
 0x25a   : > { %v2943_v43 = vld.sshfl [vmem:[#allocation1 + $0x20] sm:$0xff pattern:$0x73625140] }
 0x25b   : > { %v2870_v16 = vmax.f32 %v2838_v17, 0.0  ;;  %v2871_v19 = vmax.f32 %v2839_v54, 0.0  ;;  %v2964_v32 = vpack.c.bf16 %v2943_v43, %v2942_v14  ;;  %2946 = vst [vmem:[#allocation1 + $0x2] ss:$4 sm:$0xff] %v2869_v22 }
 0x25c   : > { %v2682_v23 = vpop.f32.mrf.mxu1 }
 0x25d   : > { %v2716_v24 = vadd.f32 %v2682_v23, %v4782_v6  ;;  %2948 = vst [vmem:[#allocation1 + $0x20] ss:$4 sm:$0xff] %v2871_v19  ;;  %3089 = vmatmul.bf16.gmra.mxu3 %v2964_v32 }
 0x25e   : > { %2947 = vst [vmem:[#allocation1 + $0x3] ss:$4 sm:$0xff] %v2870_v16 }
 0x25f   : > { %v2775_v61 = vrot.slane %v2716_v24, 2  ;;  %v2776_v26 = vrot.slane %v2716_v24, 4  ;;  %v2840_v21 = vadd.f32 %v4791_v10, %v2716_v24  ;;  %v2706_v10 = vld [vmem:[#allocation3 + $0x40] sm:$0xf] }
 0x261   : > { %v2841_v27 = vadd.f32 %v4794_v12, %v2775_v61  ;;  %v2842_v7 = vadd.f32 %v4797_v13, %v2776_v26  ;;  %v2872_v8 = vmax.f32 %v2840_v21, 0.0  ;;  %v2983_v13 = vpop.f32.mrf.mxu2 }
 0x262   : > { %v2984_v37 = vadd.f32 %v4105_v36, %v2983_v13 }
 0x263   : > { %v2873_v29 = vmax.f32 %v2841_v27, 0.0  ;;  %v2874_v30 = vmax.f32 %v2842_v7, 0.0  ;;  %2949 = vst [vmem:[#allocation1 + $0x21] ss:$4 sm:$0xff] %v2872_v8 }
 0x264   : > { %v2685_v31 = vpop.f32.mrf.mxu1 }
 0x265   : > { %2950 = vst [vmem:[#allocation1 + $0x22] ss:$4 sm:$0xff] %v2873_v29  ;;  %v2952_v25 = vld.sshfl [vmem:[#allocation1] sm:$0xff pattern:$0x73625140] }
 0x266   : > { %2951 = vst [vmem:[#allocation1 + $0x23] ss:$4 sm:$0xff] %v2874_v30 }
 0x269   : > { %v2985_v46 = vpop.f32.mrf.mxu2 }
 0x26a   : > { %v2986_v20 = vadd.f32 %v4105_v36, %v2985_v46 }
 0x26c   : > { %v2687_v6 = vpop.f32.mrf.mxu1 }
 0x26d   : > { %v2953_v39 = vld.sshfl [vmem:[#allocation1 + $0x20] sm:$0xff pattern:$0x73625140] }
 0x26e   : > { %v2965_v49 = vpack.c.bf16 %v2953_v39, %v2952_v25 }
 0x270   : > { %3094 = vmatmul.bf16.gmra.mxu3 %v2965_v49 }
 0x271   : > { %v2988_v52 = vpop.f32.mrf.mxu2 }
 0x272   : > { %v2989_v41 = vadd.f32 %v4105_v36, %v2988_v52 }
 0x274   : > { %v2690_v33 = vpop.f32.mrf.mxu1 }
 0x275   : > { %v2719_v35 = vadd.f32 %v2706_v10, %v2690_v33 }
 0x277   : > { %2732 = vst [vmem:[#allocation3 + $0x40] sm:$0xf] %v2719_v35 }
 0x279   : > { %v2990_v58 = vpop.f32.mrf.mxu2 }
 0x27a   : > { %v2991_v63 = vadd.f32 %v4105_v36, %v2990_v58 }
 0x27c   : > { %v2692_v12 = vpop.f32.mrf.mxu1 }
 0x281   : > { %v2993_v2 = vpop.f32.mrf.mxu2 }
 0x282   : > { %v2994_v50 = vadd.f32 %v4105_v36, %v2993_v2 }
 0x289   : > { %v2995_v9 = vpop.f32.mrf.mxu2 }
 0x28a   : > { %v2996_v34 = vadd.f32 %v4105_v36, %v2995_v9 }
 0x291   : > { %v2998_v17 = vpop.f32.mrf.mxu2 }
 0x292   : > { %v2999_v54 = vadd.f32 %v4105_v36, %v2998_v17 }
 0x299   : > { %v3000_v32 = vpop.f32.mrf.mxu2 }
 0x29a   : > { %v3001_v24 = vadd.f32 %v4105_v36, %v3000_v32 }
 0x2b8   : > { %v3080_v40 = vpop.f32.mrf.mxu3 }
 0x2b9   : > { %v3081_v42 = vadd.f32 %v4106_v28, %v3080_v40 }
 0x2bb   : > { %v3100_v11 = vadd.f32 %v3081_v42, %v2984_v37 }
 0x2bd   : > { %v3108_v56 = vmax.f32 %v3100_v11, 0.0 }
 0x2bf   : > { %3117 = vst.msk [vmem:[%s4852_s21] sm:$0xff] %vm3116_vm13, %v3108_v56 }
 0x2c0   : > { %v3082_v18 = vpop.f32.mrf.mxu3 }
 0x2c1   : > { %v3083_v59 = vadd.f32 %v4106_v28, %v3082_v18 }
 0x2c3   : > { %v3101_v44 = vadd.f32 %v3083_v59, %v2986_v20 }
 0x2c5   : > { %v3109_v48 = vmax.f32 %v3101_v44, 0.0 }
 0x2c7   : > { %3118 = vst.msk [vmem:[%s4852_s21 + $0x8] sm:$0xff] %vm3116_vm13, %v3109_v48 }
 0x2cb   : > { %v3085_v53 = vpop.f32.mrf.mxu3 }
 0x2cc   : > { %v3086_v55 = vadd.f32 %v4106_v28, %v3085_v53 }
 0x2ce   : > { %v3102_v57 = vadd.f32 %v3086_v55, %v2989_v41 }
 0x2d0   : > { %v3110_v45 = vmax.f32 %v3102_v57, 0.0 }
 0x2d2   : > { %3119 = vst.msk [vmem:[%s4852_s21 + $0x10] sm:$0xff] %vm3116_vm13, %v3110_v45 }
 0x2d3   : > { %v3087_v60 = vpop.f32.mrf.mxu3 }
 0x2d4   : > { %v3088_v38 = vadd.f32 %v4106_v28, %v3087_v60 }
 0x2d6   : > { %v3103_v0 = vadd.f32 %v3088_v38, %v2991_v63 }
 0x2d8   : > { %v3111_v1 = vmax.f32 %v3103_v0, 0.0 }
 0x2da   : > { %3120 = vst.msk [vmem:[%s4852_s21 + $0x18] sm:$0xff] %vm3116_vm13, %v3111_v1 }
 0x2e0   : > { %v3090_v4 = vpop.f32.mrf.mxu3 }
 0x2e1   : > { %v3091_v5 = vadd.f32 %v4106_v28, %v3090_v4 }
 0x2e3   : > { %v3104_v51 = vadd.f32 %v3091_v5, %v2994_v50 }
 0x2e5   : > { %v3112_v3 = vmax.f32 %v3104_v51, 0.0 }
 0x2e7   : > { %3121 = vst.msk [vmem:[%s4852_s21 + $0x20] sm:$0xff] %vm3116_vm13, %v3112_v3 }
 0x2e8   : > { %v3092_v14 = vpop.f32.mrf.mxu3 }
 0x2e9   : > { %v3093_v47 = vadd.f32 %v4106_v28, %v3092_v14 }
 0x2eb   : > { %v3105_v15 = vadd.f32 %v3093_v47, %v2996_v34 }
 0x2ed   : > { %v3113_v62 = vmax.f32 %v3105_v15, 0.0 }
 0x2ef   : > { %3122 = vst.msk [vmem:[%s4852_s21 + $0x28] sm:$0xff] %vm3116_vm13, %v3113_v62 }
 0x2f3   : > { %v3095_v22 = vpop.f32.mrf.mxu3 }
 0x2f4   : > { %v3096_v43 = vadd.f32 %v4106_v28, %v3095_v22 }
 0x2f6   : > { %v3106_v16 = vadd.f32 %v3096_v43, %v2999_v54 }
 0x2f8   : > { %v3114_v19 = vmax.f32 %v3106_v16, 0.0 }
 0x2fa   : > { %3123 = vst.msk [vmem:[%s4852_s21 + $0x30] sm:$0xff] %vm3116_vm13, %v3114_v19 }
 0x2fb   : > { %v3097_v23 = vpop.f32.mrf.mxu3 }
 0x2fc   : > { %v3098_v61 = vadd.f32 %v4106_v28, %v3097_v23 }
 0x2fe   : > { %v3107_v26 = vadd.f32 %v3098_v61, %v3001_v24 }
 0x300   : > { %v3115_v21 = vmax.f32 %v3107_v26, 0.0 }
 0x302   : > { %3124 = vst.msk [vmem:[%s4852_s21 + $0x38] sm:$0xff] %vm3116_vm13, %v3115_v21 }
 0x303   : > { %4138 = shalt.err (!%p4135_p3)
}
 0x304   : > { %s4176_s16 = smov 128   ;;  %s4177_s21 = smov 8  }
 0x305   : > { %4061 = dma.vmem_to_hbm [thread:$0]  (%p4266_p5), %s3139_s26, 1024, %s3141_s28, %s3126_s13, %s4176_s16, %s4176_s16, %s4177_s21  }
 0x306 PF: > { %p4067_p4 = scmp.ge.s32.totalorder %s4173_s12, 2  ;;  %s3155_s25 = sand.u32 1, %s4161_s30  }
 0x307   : > { %s3156_s14 = scalar_lea.sflag [#allocation5], %s3155_s25 }
 0x308   : > { %p4064_p7 = pnand %p4067_p4, %p4270_p6 }
 0x30a   : > { %p4065_p8 = pneg %p4064_p7 }
 0x30c   : > { %4156 = dma.done.wait (%p4065_p8), %s3156_s14, 1024  }
 0x30d   : > { %4158 = vsyncadd (%p4065_p8), %s3156_s14, 4294966272  ;;  %p19_p9 = scmp.ge.s32.totalorder %s4253_s15, 4   ;;  %s4920_s30 = smov %s4165_s10 }
 0x30e   : > { %s4921_s10 = smov %s4169_s11  ;;  %s4922_s11 = smov %s4264_s18 }
 0x30f   : > { %s4923_s12 = smov %s4253_s15  ;;  %21 = sbr.rel (!%p19_p9) target bundleno = 3 (0x3), region = 113 }
 0x314   :  { %3162 = vsyncpa [#allocation5], 1 }
 0x315   :  { %3164 = vsyncpa [#allocation5 + $0x1], 1 }

</bundles_post_ra>
